<compile_context>
chip_gen: v7x
topology: tpu7x:2x2x1
jax: 0.10.0
libtpu: 0.0.40
codegen_flags: <defaults>
</compile_context>

<pallas_src>
import functools

import jax
import jax.numpy as jnp
from jax.experimental import pallas as pl
from jax.experimental.pallas import tpu as pltpu

LN_EPS = 1e-5  # PyTorch nn.LayerNorm default eps


def _round_up(x, m):
    return (x + m - 1) // m * m


def _layernorm(h, gamma, beta):
    # PyTorch LayerNorm over last dim, biased variance, f32 math.
    mu = jnp.mean(h, axis=-1, keepdims=True)
    var = jnp.mean((h - mu) * (h - mu), axis=-1, keepdims=True)
    return (h - mu) * jax.lax.rsqrt(var + LN_EPS) * gamma + beta


def critic_kernel(s_ref, a_ref,
                  w1s_ref, w1a_ref, b1_ref, g1_ref, be1_ref,
                  w2_ref, b2_ref, g2_ref, be2_ref,
                  wq_ref, bq_ref,
                  q_ref, *, matmul_dtype):
    mm = matmul_dtype

    s = s_ref[...].astype(mm)                                   # [TB, S]
    a = a_ref[...].astype(mm)                                   # [TB, A]

    # fc1 in split-concat form (avoids materializing cat([s, a]) in HBM):
    #   cat([s, a]) @ W1 == s @ W1[:S] + a @ W1[S:]
    h1 = jnp.dot(s, w1s_ref[...].astype(mm),
                 preferred_element_type=jnp.float32)            # [TB, F1] f32 acc
    h1 = h1 + jnp.dot(a, w1a_ref[...].astype(mm),
                      preferred_element_type=jnp.float32)
    h1 = h1 + b1_ref[...]
    h1 = jnp.maximum(_layernorm(h1, g1_ref[...], be1_ref[...]), 0.0)

    # fc2 -> ln2 -> relu
    h2 = jnp.dot(h1.astype(mm), w2_ref[...].astype(mm),
                 preferred_element_type=jnp.float32)            # [TB, F2]
    h2 = h2 + b2_ref[...]
    h2 = jnp.maximum(_layernorm(h2, g2_ref[...], be2_ref[...]), 0.0)

    # q head: [TB,F2] x [F2,1] would use 1 MXU column + full result-FIFO drain;
    # do it as VPU multiply + XLU lane reduction instead (MXU stays free).
    q = jnp.sum(h2 * wq_ref[...], axis=-1, keepdims=True) + bq_ref[0, 0]   # [TB,1]
    q_ref[...] = q.astype(q_ref.dtype)


def critic_forward(state, action, params, *, block_b=512, use_bf16=False):
    """state: [B, state_dim], action: [B, action_dim] -> q: [B, 1]."""
    state = state.astype(jnp.float32)
    action = action.astype(jnp.float32)
    B, S = state.shape
    A = action.shape[1]
    (w1s, w1a, b1, g1, be1, w2, b2, g2, be2, wq, bq) = params
    F1 = w1s.shape[1]
    F2 = w2.shape[1]

    # Batch tile: multiple of 128 rows (8-sublane aligned, lane-friendly), capped
    # by block_b. Keep block_b <= ~2048 so double-buffered tiles fit easily inside
    # v7x's 64 MiB VMEM (half of v5e/v6e).
    tb = min(_round_up(block_b, 128), _round_up(B, 128))
    b_pad = _round_up(B, tb)
    if b_pad != B:
        state = jnp.pad(state, ((0, b_pad - B), (0, 0)))
        action = jnp.pad(action, ((0, b_pad - B), (0, 0)))
    grid = (b_pad // tb,)

    def resident(shape):
        # Weights / norm params: same block every grid step -> stay VMEM-resident.
        nd = len(shape)
        return pl.BlockSpec(shape, lambda i, _nd=nd: (0,) * _nd)  # no late binding

    in_specs = [
        pl.BlockSpec((tb, S), lambda i: (i, 0)),        # state batch tile
        pl.BlockSpec((tb, A), lambda i: (i, 0)),        # action batch tile
        resident((S, F1)), resident((A, F1)),           # W1 split (state / action rows)
        resident((1, F1)), resident((1, F1)), resident((1, F1)),   # b1, gamma1, beta1
        resident((F1, F2)),                             # W2
        resident((1, F2)), resident((1, F2)), resident((1, F2)),   # b2, gamma2, beta2
        resident((1, F2)),                              # wq as a row vector
        pl.BlockSpec(memory_space=pltpu.MemorySpace.SMEM),          # bq scalar (1,1)
    ]
    out_specs = pl.BlockSpec((tb, 1), lambda i: (i, 0))

    flops = (2 * b_pad * ((S + A) * F1 + F1 * F2 + F2)       # matmuls + q head
             + 10 * b_pad * (F1 + F2))                       # LN / bias / relu
    bytes_accessed = 4 * (b_pad * (S + A + 1)
                          + (S + A) * F1 + F1 * F2
                          + 3 * F1 + 4 * F2 + 1)
    cost = pl.CostEstimate(flops=int(flops),
                           transcendentals=int(2 * b_pad),   # 2 rsqrt per row
                           bytes_accessed=int(bytes_accessed))

    kernel = functools.partial(
        critic_kernel,
        matmul_dtype=jnp.bfloat16 if use_bf16 else jnp.float32)

    q_pad = pl.pallas_call(
        kernel,
        out_shape=jax.ShapeDtypeStruct((b_pad, 1), jnp.float32),
        grid=grid,
        in_specs=in_specs,
        out_specs=out_specs,
        compiler_params=pltpu.CompilerParams(
            dimension_semantics=("parallel",)),               # megacore on v7x
        cost_estimate=cost,
    )(state, action, w1s, w1a, b1, g1, be1, w2, b2, g2, be2, wq, bq)

    return q_pad[:B]


def init_params(key, state_dim, action_dim, fc1_dim, fc2_dim):
    """Deterministic synthetic init (PyTorch-like uniform fan-in bounds)."""
    ks = jax.random.split(key, 6)

    def lin(kw, kb, fan_in, fan_out):
        bound = 1.0 / float(fan_in) ** 0.5
        w = jax.random.uniform(kw, (fan_in, fan_out), jnp.float32, -bound, bound)
        b = jax.random.uniform(kb, (1, fan_out), jnp.float32, -bound, bound)
        return w, b

    w1, b1 = lin(ks[0], ks[1], state_dim + action_dim, fc1_dim)
    w1s, w1a = w1[:state_dim], w1[state_dim:]               # split for in-kernel concat
    w2, b2 = lin(ks[2], ks[3], fc1_dim, fc2_dim)
    wq_col, bq = lin(ks[4], ks[5], fc2_dim, 1)
    wq = wq_col.reshape(1, fc2_dim)                          # row vector for VPU q head
    bq = bq.reshape(1, 1)
    g1 = jnp.ones((1, fc1_dim), jnp.float32)
    be1 = jnp.zeros((1, fc1_dim), jnp.float32)
    g2 = jnp.ones((1, fc2_dim), jnp.float32)
    be2 = jnp.zeros((1, fc2_dim), jnp.float32)
    # NOTE: fc widths that are multiples of 128 use the vregs/MXU far better; the
    # kernel works for any width (here 32, matching typical TD3 configs).
    return (w1s, w1a, b1, g1, be1, w2, b2, g2, be2, wq, bq)


def _reference(state, action, params):
    (w1s, w1a, b1, g1, be1, w2, b2, g2, be2, wq, bq) = params
    x = jnp.concatenate([state, action], axis=-1)
    w1 = jnp.concatenate([w1s, w1a], axis=0)
    h = x @ w1 + b1
    mu = h.mean(-1, keepdims=True)
    var = ((h - mu) ** 2).mean(-1, keepdims=True)
    h = jnp.maximum((h - mu) / jnp.sqrt(var + LN_EPS) * g1 + be1, 0.0)
    h = h @ w2 + b2
    mu = h.mean(-1, keepdims=True)
    var = ((h - mu) ** 2).mean(-1, keepdims=True)
    h = jnp.maximum((h - mu) / jnp.sqrt(var + LN_EPS) * g2 + be2, 0.0)
    return h @ wq.T + bq


if __name__ == "__main__":
    # Small shapes consistent with the module (parking env obs ~12, action small).
    batch, state_dim, action_dim, fc1_dim, fc2_dim = 8, 12, 4, 32, 32

    key = jax.random.PRNGKey(0)
    k_s, k_a, k_p, k_s2, k_a2 = jax.random.split(key, 5)
    state = jax.random.normal(k_s, (batch, state_dim), jnp.float32)
    action = jax.random.normal(k_a, (batch, action_dim), jnp.float32)
    params = init_params(k_p, state_dim, action_dim, fc1_dim, fc2_dim)

    # f32 path: exact module semantics.
    q = critic_forward(state, action, params)
    jax.block_until_ready(q)
    q_ref = _reference(state, action, params)
    assert q.shape == (batch, 1)
    assert jnp.allclose(q, q_ref, atol=1e-5, rtol=1e-5)

    # Larger batch: exercises the multi-tile grid (+ padding) path.
    batch_big = 300
    state_b = jax.random.normal(k_s2, (batch_big, state_dim), jnp.float32)
    action_b = jax.random.normal(k_a2, (batch_big, action_dim), jnp.float32)
    q_big = critic_forward(state_b, action_b, params, block_b=128)
    jax.block_until_ready(q_big)
    q_big_ref = _reference(state_b, action_b, params)
    assert q_big.shape == (batch_big, 1)
    assert jnp.allclose(q_big, q_big_ref, atol=1e-5, rtol=1e-5)

    # bf16 MXU-operand path (v6e/v7x fast path); LN/ReLU still f32.
    q_bf16 = critic_forward(state_b, action_b, params, block_b=128, use_bf16=True)
    jax.block_until_ready(q_bf16)
    assert jnp.allclose(q_bf16, q_big_ref, atol=5e-2, rtol=5e-2)

    print("KERNEL_OK")
</pallas_src>

<mosaic_0001>
module attributes {stable_mosaic.version = 11 : i64} {
  func.func @critic_kernel(%arg0: i32, %arg1: memref<128x12xf32, #tpu.memory_space<vmem>>, %arg2: memref<128x4xf32, #tpu.memory_space<vmem>>, %arg3: memref<12x32xf32, #tpu.memory_space<vmem>>, %arg4: memref<4x32xf32, #tpu.memory_space<vmem>>, %arg5: memref<1x32xf32, #tpu.memory_space<vmem>>, %arg6: memref<1x32xf32, #tpu.memory_space<vmem>>, %arg7: memref<1x32xf32, #tpu.memory_space<vmem>>, %arg8: memref<32x32xf32, #tpu.memory_space<vmem>>, %arg9: memref<1x32xf32, #tpu.memory_space<vmem>>, %arg10: memref<1x32xf32, #tpu.memory_space<vmem>>, %arg11: memref<1x32xf32, #tpu.memory_space<vmem>>, %arg12: memref<1x32xf32, #tpu.memory_space<vmem>>, %arg13: memref<1x1xf32, #tpu.memory_space<smem>>, %arg14: memref<128x1xf32, #tpu.memory_space<vmem>>) attributes {dimension_semantics = [#tpu.dimension_semantics<parallel>], iteration_bounds = array<i64: 1>, scalar_prefetch = 0 : i64, scratch_operands = 0 : i64, tpu.core_type = #tpu.core_type<tc>, window_params = [{transform_indices = @transform_0, window_bounds = array<i64: 128, 12>}, {transform_indices = @transform_1, window_bounds = array<i64: 128, 4>}, {pipeline_mode = #tpu.pipeline_mode<synchronous>, transform_indices = @transform_2, window_bounds = array<i64: 12, 32>}, {pipeline_mode = #tpu.pipeline_mode<synchronous>, transform_indices = @transform_3, window_bounds = array<i64: 4, 32>}, {pipeline_mode = #tpu.pipeline_mode<synchronous>, transform_indices = @transform_4, window_bounds = array<i64: 1, 32>}, {pipeline_mode = #tpu.pipeline_mode<synchronous>, transform_indices = @transform_5, window_bounds = array<i64: 1, 32>}, {pipeline_mode = #tpu.pipeline_mode<synchronous>, transform_indices = @transform_6, window_bounds = array<i64: 1, 32>}, {pipeline_mode = #tpu.pipeline_mode<synchronous>, transform_indices = @transform_7, window_bounds = array<i64: 32, 32>}, {pipeline_mode = #tpu.pipeline_mode<synchronous>, transform_indices = @transform_8, window_bounds = array<i64: 1, 32>}, {pipeline_mode = #tpu.pipeline_mode<synchronous>, transform_indices = @transform_9, window_bounds = array<i64: 1, 32>}, {pipeline_mode = #tpu.pipeline_mode<synchronous>, transform_indices = @transform_10, window_bounds = array<i64: 1, 32>}, {pipeline_mode = #tpu.pipeline_mode<synchronous>, transform_indices = @transform_11, window_bounds = array<i64: 1, 32>}, {transform_indices = @transform_12, window_bounds = array<i64: 1, 1>}, {transform_indices = @transform_13, window_bounds = array<i64: 128, 1>}]} {
    %c0 = arith.constant 0 : index
    %c0_0 = arith.constant 0 : index
    %0 = vector.load %arg1[%c0, %c0_0] : memref<128x12xf32, #tpu.memory_space<vmem>>, vector<128x12xf32>
    %c0_1 = arith.constant 0 : index
    %c0_2 = arith.constant 0 : index
    %1 = vector.load %arg2[%c0_1, %c0_2] : memref<128x4xf32, #tpu.memory_space<vmem>>, vector<128x4xf32>
    %c0_3 = arith.constant 0 : index
    %c0_4 = arith.constant 0 : index
    %2 = vector.load %arg3[%c0_3, %c0_4] : memref<12x32xf32, #tpu.memory_space<vmem>>, vector<12x32xf32>
    %cst = arith.constant dense<0.000000e+00> : vector<128x32xf32>
    %3 = tpu.matmul %0, %2, %cst {dimension_numbers = #tpu.dot_dimension_numbers<[1], [0], [0], [1], [0, 0, 1, 1], [], []>} : vector<128x12xf32>, vector<12x32xf32>, vector<128x32xf32> -> vector<128x32xf32>
    %c0_5 = arith.constant 0 : index
    %c0_6 = arith.constant 0 : index
    %4 = vector.load %arg4[%c0_5, %c0_6] : memref<4x32xf32, #tpu.memory_space<vmem>>, vector<4x32xf32>
    %cst_7 = arith.constant dense<0.000000e+00> : vector<128x32xf32>
    %5 = tpu.matmul %1, %4, %cst_7 {dimension_numbers = #tpu.dot_dimension_numbers<[1], [0], [0], [1], [0, 0, 1, 1], [], []>} : vector<128x4xf32>, vector<4x32xf32>, vector<128x32xf32> -> vector<128x32xf32>
    %6 = arith.addf %3, %5 : vector<128x32xf32>
    %c0_8 = arith.constant 0 : index
    %c0_9 = arith.constant 0 : index
    %7 = vector.load %arg5[%c0_8, %c0_9] : memref<1x32xf32, #tpu.memory_space<vmem>>, vector<1x32xf32>
    %8 = vector.broadcast %7 : vector<1x32xf32> to vector<128x32xf32>
    %9 = arith.addf %6, %8 : vector<128x32xf32>
    %c0_10 = arith.constant 0 : index
    %c0_11 = arith.constant 0 : index
    %10 = vector.load %arg6[%c0_10, %c0_11] : memref<1x32xf32, #tpu.memory_space<vmem>>, vector<1x32xf32>
    %c0_12 = arith.constant 0 : index
    %c0_13 = arith.constant 0 : index
    %11 = vector.load %arg7[%c0_12, %c0_13] : memref<1x32xf32, #tpu.memory_space<vmem>>, vector<1x32xf32>
    %cst_14 = arith.constant dense<0.000000e+00> : vector<128xf32>
    %12 = vector.multi_reduction <add>, %9, %cst_14 [1] : vector<128x32xf32> to vector<128xf32>
    %13 = vector.shape_cast %12 : vector<128xf32> to vector<128x1xf32>
    %cst_15 = arith.constant 3.200000e+01 : f32
    %14 = vector.broadcast %cst_15 : f32 to vector<128x1xf32>
    %15 = arith.divf %13, %14 : vector<128x1xf32>
    %16 = vector.broadcast %15 : vector<128x1xf32> to vector<128x32xf32>
    %17 = arith.subf %9, %16 : vector<128x32xf32>
    %18 = vector.broadcast %15 : vector<128x1xf32> to vector<128x32xf32>
    %19 = arith.subf %9, %18 : vector<128x32xf32>
    %20 = arith.mulf %17, %19 : vector<128x32xf32>
    %cst_16 = arith.constant dense<0.000000e+00> : vector<128xf32>
    %21 = vector.multi_reduction <add>, %20, %cst_16 [1] : vector<128x32xf32> to vector<128xf32>
    %22 = vector.shape_cast %21 : vector<128xf32> to vector<128x1xf32>
    %cst_17 = arith.constant 3.200000e+01 : f32
    %23 = vector.broadcast %cst_17 : f32 to vector<128x1xf32>
    %24 = arith.divf %22, %23 : vector<128x1xf32>
    %25 = vector.broadcast %15 : vector<128x1xf32> to vector<128x32xf32>
    %26 = arith.subf %9, %25 : vector<128x32xf32>
    %cst_18 = arith.constant 9.99999974E-6 : f32
    %27 = vector.broadcast %cst_18 : f32 to vector<128x1xf32>
    %28 = arith.addf %24, %27 : vector<128x1xf32>
    %29 = math.rsqrt %28 : vector<128x1xf32>
    %30 = vector.broadcast %29 : vector<128x1xf32> to vector<128x32xf32>
    %31 = arith.mulf %26, %30 : vector<128x32xf32>
    %32 = vector.broadcast %10 : vector<1x32xf32> to vector<128x32xf32>
    %33 = arith.mulf %31, %32 : vector<128x32xf32>
    %34 = vector.broadcast %11 : vector<1x32xf32> to vector<128x32xf32>
    %35 = arith.addf %33, %34 : vector<128x32xf32>
    %cst_19 = arith.constant 0.000000e+00 : f32
    %36 = vector.broadcast %cst_19 : f32 to vector<128x32xf32>
    %37 = arith.maximumf %35, %36 : vector<128x32xf32>
    %c0_20 = arith.constant 0 : index
    %c0_21 = arith.constant 0 : index
    %38 = vector.load %arg8[%c0_20, %c0_21] : memref<32x32xf32, #tpu.memory_space<vmem>>, vector<32x32xf32>
    %cst_22 = arith.constant dense<0.000000e+00> : vector<128x32xf32>
    %39 = tpu.matmul %37, %38, %cst_22 {dimension_numbers = #tpu.dot_dimension_numbers<[1], [0], [0], [1], [0, 0, 1, 1], [], []>} : vector<128x32xf32>, vector<32x32xf32>, vector<128x32xf32> -> vector<128x32xf32>
    %c0_23 = arith.constant 0 : index
    %c0_24 = arith.constant 0 : index
    %40 = vector.load %arg9[%c0_23, %c0_24] : memref<1x32xf32, #tpu.memory_space<vmem>>, vector<1x32xf32>
    %41 = vector.broadcast %40 : vector<1x32xf32> to vector<128x32xf32>
    %42 = arith.addf %39, %41 : vector<128x32xf32>
    %c0_25 = arith.constant 0 : index
    %c0_26 = arith.constant 0 : index
    %43 = vector.load %arg10[%c0_25, %c0_26] : memref<1x32xf32, #tpu.memory_space<vmem>>, vector<1x32xf32>
    %c0_27 = arith.constant 0 : index
    %c0_28 = arith.constant 0 : index
    %44 = vector.load %arg11[%c0_27, %c0_28] : memref<1x32xf32, #tpu.memory_space<vmem>>, vector<1x32xf32>
    %cst_29 = arith.constant dense<0.000000e+00> : vector<128xf32>
    %45 = vector.multi_reduction <add>, %42, %cst_29 [1] : vector<128x32xf32> to vector<128xf32>
    %46 = vector.shape_cast %45 : vector<128xf32> to vector<128x1xf32>
    %cst_30 = arith.constant 3.200000e+01 : f32
    %47 = vector.broadcast %cst_30 : f32 to vector<128x1xf32>
    %48 = arith.divf %46, %47 : vector<128x1xf32>
    %49 = vector.broadcast %48 : vector<128x1xf32> to vector<128x32xf32>
    %50 = arith.subf %42, %49 : vector<128x32xf32>
    %51 = vector.broadcast %48 : vector<128x1xf32> to vector<128x32xf32>
    %52 = arith.subf %42, %51 : vector<128x32xf32>
    %53 = arith.mulf %50, %52 : vector<128x32xf32>
    %cst_31 = arith.constant dense<0.000000e+00> : vector<128xf32>
    %54 = vector.multi_reduction <add>, %53, %cst_31 [1] : vector<128x32xf32> to vector<128xf32>
    %55 = vector.shape_cast %54 : vector<128xf32> to vector<128x1xf32>
    %cst_32 = arith.constant 3.200000e+01 : f32
    %56 = vector.broadcast %cst_32 : f32 to vector<128x1xf32>
    %57 = arith.divf %55, %56 : vector<128x1xf32>
    %58 = vector.broadcast %48 : vector<128x1xf32> to vector<128x32xf32>
    %59 = arith.subf %42, %58 : vector<128x32xf32>
    %cst_33 = arith.constant 9.99999974E-6 : f32
    %60 = vector.broadcast %cst_33 : f32 to vector<128x1xf32>
    %61 = arith.addf %57, %60 : vector<128x1xf32>
    %62 = math.rsqrt %61 : vector<128x1xf32>
    %63 = vector.broadcast %62 : vector<128x1xf32> to vector<128x32xf32>
    %64 = arith.mulf %59, %63 : vector<128x32xf32>
    %65 = vector.broadcast %43 : vector<1x32xf32> to vector<128x32xf32>
    %66 = arith.mulf %64, %65 : vector<128x32xf32>
    %67 = vector.broadcast %44 : vector<1x32xf32> to vector<128x32xf32>
    %68 = arith.addf %66, %67 : vector<128x32xf32>
    %cst_34 = arith.constant 0.000000e+00 : f32
    %69 = vector.broadcast %cst_34 : f32 to vector<128x32xf32>
    %70 = arith.maximumf %68, %69 : vector<128x32xf32>
    %c0_35 = arith.constant 0 : index
    %c0_36 = arith.constant 0 : index
    %71 = vector.load %arg12[%c0_35, %c0_36] : memref<1x32xf32, #tpu.memory_space<vmem>>, vector<1x32xf32>
    %72 = vector.broadcast %71 : vector<1x32xf32> to vector<128x32xf32>
    %73 = arith.mulf %70, %72 : vector<128x32xf32>
    %cst_37 = arith.constant dense<0.000000e+00> : vector<128xf32>
    %74 = vector.multi_reduction <add>, %73, %cst_37 [1] : vector<128x32xf32> to vector<128xf32>
    %75 = vector.shape_cast %74 : vector<128xf32> to vector<128x1xf32>
    %c0_38 = arith.constant 0 : index
    %c0_39 = arith.constant 0 : index
    %76 = memref.load %arg13[%c0_38, %c0_39] : memref<1x1xf32, #tpu.memory_space<smem>>
    %77 = vector.broadcast %76 : f32 to vector<128x1xf32>
    %78 = arith.addf %75, %77 : vector<128x1xf32>
    %c0_40 = arith.constant 0 : index
    %c0_41 = arith.constant 0 : index
    %79 = vector.load %arg14[%c0_40, %c0_41] : memref<128x1xf32, #tpu.memory_space<vmem>>, vector<128x1xf32>
    tpu.vector_store %arg14[%c0_40, %c0_41], %78 {strides = array<i32>} : memref<128x1xf32, #tpu.memory_space<vmem>>, vector<128x1xf32>,
    return
  }
  func.func @transform_0(%arg0: i32) -> (i32, i32) {
    %c0_i32 = arith.constant 0 : i32
    %c0_i32_0 = arith.constant 0 : i32
    return %arg0, %c0_i32 : i32, i32
  }
  func.func @transform_1(%arg0: i32) -> (i32, i32) {
    %c0_i32 = arith.constant 0 : i32
    %c0_i32_0 = arith.constant 0 : i32
    return %arg0, %c0_i32 : i32, i32
  }
  func.func @transform_2(%arg0: i32) -> (i32, i32) {
    %c0_i32 = arith.constant 0 : i32
    %c0_i32_0 = arith.constant 0 : i32
    %c0_i32_1 = arith.constant 0 : i32
    return %c0_i32, %c0_i32_0 : i32, i32
  }
  func.func @transform_3(%arg0: i32) -> (i32, i32) {
    %c0_i32 = arith.constant 0 : i32
    %c0_i32_0 = arith.constant 0 : i32
    %c0_i32_1 = arith.constant 0 : i32
    return %c0_i32, %c0_i32_0 : i32, i32
  }
  func.func @transform_4(%arg0: i32) -> (i32, i32) {
    %c0_i32 = arith.constant 0 : i32
    %c0_i32_0 = arith.constant 0 : i32
    %c0_i32_1 = arith.constant 0 : i32
    return %c0_i32, %c0_i32_0 : i32, i32
  }
  func.func @transform_5(%arg0: i32) -> (i32, i32) {
    %c0_i32 = arith.constant 0 : i32
    %c0_i32_0 = arith.constant 0 : i32
    %c0_i32_1 = arith.constant 0 : i32
    return %c0_i32, %c0_i32_0 : i32, i32
  }
  func.func @transform_6(%arg0: i32) -> (i32, i32) {
    %c0_i32 = arith.constant 0 : i32
    %c0_i32_0 = arith.constant 0 : i32
    %c0_i32_1 = arith.constant 0 : i32
    return %c0_i32, %c0_i32_0 : i32, i32
  }
  func.func @transform_7(%arg0: i32) -> (i32, i32) {
    %c0_i32 = arith.constant 0 : i32
    %c0_i32_0 = arith.constant 0 : i32
    %c0_i32_1 = arith.constant 0 : i32
    return %c0_i32, %c0_i32_0 : i32, i32
  }
  func.func @transform_8(%arg0: i32) -> (i32, i32) {
    %c0_i32 = arith.constant 0 : i32
    %c0_i32_0 = arith.constant 0 : i32
    %c0_i32_1 = arith.constant 0 : i32
    return %c0_i32, %c0_i32_0 : i32, i32
  }
  func.func @transform_9(%arg0: i32) -> (i32, i32) {
    %c0_i32 = arith.constant 0 : i32
    %c0_i32_0 = arith.constant 0 : i32
    %c0_i32_1 = arith.constant 0 : i32
    return %c0_i32, %c0_i32_0 : i32, i32
  }
  func.func @transform_10(%arg0: i32) -> (i32, i32) {
    %c0_i32 = arith.constant 0 : i32
    %c0_i32_0 = arith.constant 0 : i32
    %c0_i32_1 = arith.constant 0 : i32
    return %c0_i32, %c0_i32_0 : i32, i32
  }
  func.func @transform_11(%arg0: i32) -> (i32, i32) {
    %c0_i32 = arith.constant 0 : i32
    %c0_i32_0 = arith.constant 0 : i32
    %c0_i32_1 = arith.constant 0 : i32
    return %c0_i32, %c0_i32_0 : i32, i32
  }
  func.func @transform_12(%arg0: i32) -> (i32, i32) {
    %c0_i32 = arith.constant 0 : i32
    %c0_i32_0 = arith.constant 0 : i32
    %c0_i32_1 = arith.constant 0 : i32
    return %c0_i32, %c0_i32_0 : i32, i32
  }
  func.func @transform_13(%arg0: i32) -> (i32, i32) {
    %c0_i32 = arith.constant 0 : i32
    %c0_i32_0 = arith.constant 0 : i32
    return %arg0, %c0_i32 : i32, i32
  }
}

</mosaic_0001>

<bundles_post_ra>
// kernel: tpu_custom_call.1
= control target key start
LH: loop header
LB: loop body
LE: loop exit
PB: predicated region body
PF: predicated region fallthrough
CT: control target
= control target key end

     0   :  { %vm129_vm0 = vcmask 1043456   ;;  %vm80_vm1 = vcmask 31744   ;;  %vm1649_vm2 = vmmov 1   ;;  %vm278_vm4 = vcmask 97280   ;;  %s2454_s3 = inlined_call_operand.vmem [shape: f32[4,32], index: 3, kind: input, shape index: {}]   ;;  %s2455_s1 = inlined_call_operand.vmem [shape: f32[128,4], index: 1, kind: input, shape index: {}]   ;;  %s2456_s2 = inlined_call_operand.vmem [shape: f32[12,32], index: 2, kind: input, shape index: {}]   ;;  %s2457_s0 = inlined_call_operand.vmem [shape: f32[128,12], index: 0, kind: input, shape index: {}]   ;;  %s2458_s4 = inlined_call_operand.vmem [shape: f32[1,32], index: 4, kind: input, shape index: {}]   ;;  %s2459_s7 = inlined_call_operand.vmem [shape: f32[32,32], index: 7, kind: input, shape index: {}]   ;;  %s2460_s5 = inlined_call_operand.vmem [shape: f32[1,32], index: 5, kind: input, shape index: {}]   ;;  %s2461_s6 = inlined_call_operand.vmem [shape: f32[1,32], index: 6, kind: input, shape index: {}]   ;;  %s2462_s8 = inlined_call_operand.vmem [shape: f32[1,32], index: 8, kind: input, shape index: {}]   ;;  %s2463_s9 = inlined_call_operand.vmem [shape: f32[1,32], index: 9, kind: input, shape index: {}]   ;;  %s2464_s10 = inlined_call_operand.vmem [shape: f32[1,32], index: 10, kind: input, shape index: {}]   ;;  %s2465_s11 = inlined_call_operand.vmem [shape: f32[1,32], index: 11, kind: input, shape index: {}]   ;;  %s2466_s12 = inlined_call_operand.<no memory space> [shape: f32[1,1], index: 12, kind: input, shape index: {}]   ;;  %s2467_s13 = inlined_call_operand.vmem [shape: f32[128,1], index: 13, kind: output, shape index: {}]  }
   0x1   :  { %v79_v0 = vld [vmem:[%s2454_s3] sm:$0xf]  ;;  %v62_v2 = vld [vmem:[%s2455_s1 + $0x8] sm:$0xff]  ;;  %vm1553_vm3 = vmpackc.low %vm129_vm0, %vm1649_vm2  ;;  %vm500_vm5 = vcmask 261120   ;;  %vm1333_vm6 = vcmask 7168  }
   0x2   :  { %v61_v1 = vld [vmem:[%s2455_s1] sm:$0xff]  ;;  %1466 = vmatprep.subr.msk.mxu0 %vm129_vm0, %v79_v0  ;;  %v78_v4 = vld [vmem:[%s2456_s2 + $0x8] sm:$0xf]  ;;  %v63_v6 = vld [vmem:[%s2455_s1 + $0x10] sm:$0xff]  ;;  %1566 = vmatprep.subr.msk.mxu1 %vm129_vm0, %v79_v0 }
   0x3   :  { %1468 = vmatprep.mubr.msk.f32.mxu0 %vm80_vm1, %v61_v1  ;;  %v77_v3 = vld [vmem:[%s2456_s2] sm:$0xff]  ;;  %1467 = vmatpush3.msk.msra.mxu0 %vm129_vm0, %v79_v0  ;;  %v64_v7 = vld [vmem:[%s2455_s1 + $0x18] sm:$0xff]  ;;  %v70_v10 = vld [vmem:[%s2455_s1 + $0x48] sm:$0xff] }
   0x4   :  { %v1552_v5 = vpack.c.bf16 %v78_v4, %v77_v3  ;;  %1469 = vmatmul.mubr.msk.f32.vlgmr.msra.gmra.mrb[0].mxu0 %vm80_vm1, %v62_v2  ;;  %1567 = vmatpush3.msk.msra.mxu1 %vm129_vm0, %v79_v0  ;;  %v65_v8 = vld [vmem:[%s2455_s1 + $0x20] sm:$0xff]  ;;  %v66_v11 = vld [vmem:[%s2455_s1 + $0x28] sm:$0xff]  ;;  %v71_v12 = vld [vmem:[%s2455_s1 + $0x50] sm:$0xff] }
   0x5   :  { %1471 = vmatprep.mubr.msk.f32.mxu0 %vm80_vm1, %v63_v6  ;;  %v69_v9 = vld [vmem:[%s2455_s1 + $0x40] sm:$0xff]  ;;  %v67_v13 = vld [vmem:[%s2455_s1 + $0x30] sm:$0xff]  ;;  %v72_v14 = vld [vmem:[%s2455_s1 + $0x58] sm:$0xff] }
   0x6   :  { %1554 = vmatprep.subr.msk.bf16.mxu0 %vm1553_vm3, %v1552_v5  ;;  %1480 = vmatprep.mubr.msk.f32.mxu1 %vm80_vm1, %v69_v9  ;;  %v73_v15 = vld [vmem:[%s2455_s1 + $0x60] sm:$0xff]  ;;  %v68_v16 = vld [vmem:[%s2455_s1 + $0x38] sm:$0xff]  ;;  %v74_v18 = vld [vmem:[%s2455_s1 + $0x68] sm:$0xff] }
   0x7   :  { %1557 = vmatpush3.bf16.msk.msra.mxu0 %vm1553_vm3, %v1552_v5  ;;  %1481 = vmatmul.mubr.msk.f32.vlgmr.msra.gmra.mrb[0].mxu1 %vm80_vm1, %v70_v10  ;;  %v45_v17 = vld [vmem:[%s2457_s0] sm:$0xff]  ;;  %v75_v19 = vld [vmem:[%s2455_s1 + $0x70] sm:$0xff]  ;;  %v46_v20 = vld [vmem:[%s2457_s0 + $0x8] sm:$0xff] }
   0x8   :  { %1472 = vmatmul.mubr.msk.f32.gmra.mrb[2].mxu0 %vm80_vm1, %v64_v7  ;;  %1483 = vmatprep.mubr.msk.f32.mxu1 %vm80_vm1, %v71_v12  ;;  %v47_v21 = vld [vmem:[%s2457_s0 + $0x10] sm:$0xff]  ;;  %v76_v22 = vld [vmem:[%s2455_s1 + $0x78] sm:$0xff]  ;;  %v49_v24 = vld [vmem:[%s2457_s0 + $0x20] sm:$0xff] }
   0x9   :  { %1474 = vmatprep.mubr.msk.f32.mxu0 %vm80_vm1, %v65_v8  ;;  %v48_v23 = vld [vmem:[%s2457_s0 + $0x18] sm:$0xff]  ;;  %v50_v25 = vld [vmem:[%s2457_s0 + $0x28] sm:$0xff]  ;;  %v51_v26 = vld [vmem:[%s2457_s0 + $0x30] sm:$0xff] }
   0xa   :  { %v52_v27 = vld [vmem:[%s2457_s0 + $0x38] sm:$0xff]  ;;  %v53_v28 = vld [vmem:[%s2457_s0 + $0x40] sm:$0xff]  ;;  %v54_v29 = vld [vmem:[%s2457_s0 + $0x48] sm:$0xff] }
   0xb   :  { %1484 = vmatmul.mubr.msk.f32.gmra.mrb[2].mxu1 %vm80_vm1, %v72_v14  ;;  %v55_v30 = vld [vmem:[%s2457_s0 + $0x50] sm:$0xff]  ;;  %v56_v31 = vld [vmem:[%s2457_s0 + $0x58] sm:$0xff]  ;;  %v57_v32 = vld [vmem:[%s2457_s0 + $0x60] sm:$0xff] }
   0xc   :  { %1475 = vmatmul.mubr.msk.f32.gmra.mrb[4].mxu0 %vm80_vm1, %v66_v11  ;;  %1486 = vmatprep.mubr.msk.f32.mxu1 %vm80_vm1, %v73_v15  ;;  %v58_v33 = vld [vmem:[%s2457_s0 + $0x68] sm:$0xff]  ;;  %v59_v34 = vld [vmem:[%s2457_s0 + $0x70] sm:$0xff]  ;;  %v60_v35 = vld [vmem:[%s2457_s0 + $0x78] sm:$0xff] }
   0xd   :  { %1477 = vmatprep.mubr.msk.f32.mxu0 %vm80_vm1, %v67_v13  ;;  %v1865_v42 = vld [vmem:[%s2458_s4] ss:$0 sm:$0xff] }
   0xf   :  { %1487 = vmatmul.mubr.msk.f32.gmra.mrb[4].mxu1 %vm80_vm1, %v74_v18 }
  0x10   :  { %1478 = vmatmul.mubr.msk.f32.gmra.mrb[6].mxu0 %vm80_vm1, %v68_v16  ;;  %1489 = vmatprep.mubr.msk.f32.mxu1 %vm80_vm1, %v75_v19 }
  0x11   :  { %1496 = vmatprep.mubr.msk.f32.mxu0 %vm278_vm4, %v45_v17 }
  0x13   :  { %1490 = vmatmul.mubr.msk.f32.gmra.mrb[6].mxu1 %vm80_vm1, %v76_v22 }
  0x14   :  { %1497 = vmatmul.mubr.msk.f32.vlgmr.msra.gmra.mrb[0].mxu0 %vm278_vm4, %v46_v20 }
  0x15   :  { %1499 = vmatprep.mubr.msk.f32.mxu0 %vm278_vm4, %v47_v21 }
  0x18   :  { %1500 = vmatmul.mubr.msk.f32.gmra.mrb[2].mxu0 %vm278_vm4, %v48_v23 }
  0x19   :  { %1502 = vmatprep.mubr.msk.f32.mxu0 %vm278_vm4, %v49_v24 }
  0x1c   :  { %1503 = vmatmul.mubr.msk.f32.gmra.mrb[4].mxu0 %vm278_vm4, %v50_v25 }
  0x1d   :  { %1505 = vmatprep.mubr.msk.f32.mxu0 %vm278_vm4, %v51_v26 }
  0x20   :  { %1506 = vmatmul.mubr.msk.f32.gmra.mrb[6].mxu0 %vm278_vm4, %v52_v27 }
  0x21   :  { %1508 = vmatprep.mubr.msk.f32.mxu0 %vm278_vm4, %v53_v28 }
  0x24   :  { %1509 = vmatmul.mubr.msk.f32.gmra.mrb[8].mxu0 %vm278_vm4, %v54_v29 }
  0x25   :  { %1511 = vmatprep.mubr.msk.f32.mxu0 %vm278_vm4, %v55_v30 }
  0x28   :  { %1512 = vmatmul.mubr.msk.f32.gmra.mrb[10].mxu0 %vm278_vm4, %v56_v31 }
  0x29   :  { %1514 = vmatprep.mubr.msk.f32.mxu0 %vm278_vm4, %v57_v32 }
  0x2c   :  { %1515 = vmatmul.mubr.msk.f32.gmra.mrb[12].mxu0 %vm278_vm4, %v58_v33 }
  0x2d   :  { %1517 = vmatprep.mubr.msk.f32.mxu0 %vm278_vm4, %v59_v34 }
  0x30   :  { %1518 = vmatmul.mubr.msk.f32.gmra.mrb[14].mxu0 %vm278_vm4, %v60_v35 }
  0xda   :  { %v1482_v36 = vpop.f32.mrb[0].mxu1 }
  0xdb   :  { %v239_v37 = vpop.f32.mrb[1].mxu1 }
  0xde   :  { %v1485_v38 = vpop.f32.mrb[2].mxu1 }
  0xdf   :  { %v249_v39 = vpop.f32.mrb[3].mxu1 }
  0xe2   :  { %v1488_v40 = vpop.f32.mrb[4].mxu1 }
  0xe3   :  { %v259_v41 = vpop.f32.mrb[5].mxu1 }
  0xe6   :  { %v1491_v45 = vpop.f32.mrb[6].mxu1 }
  0xe7   :  { %v1498_v43 = vpop.f32.mrb[0].mxu0  ;;  %v269_v47 = vpop.f32.mrb[7].mxu1 }
  0xe8   :  { %v396_v44 = vpop.f32.mrb[1].mxu0  ;;  %v1871_v48 = vadd.f32 %v1498_v43, %v1865_v42 }
  0xe9   :  { %v1868_v46 = vadd.f32 %v1865_v42, %v396_v44 }
  0xea   :  { %v504_v55 = vsel %vm500_vm5, %v1871_v48, 0.0 }
  0xeb   :  { %v1501_v49 = vpop.f32.mrb[2].mxu0  ;;  %v501_v50 = vsel %vm500_vm5, %v1868_v46, 0.0 }
  0xec   :  { %502 = vadd.xlane.f32.xlu0 %v501_v50  ;;  %v406_v51 = vpop.f32.mrb[3].mxu0  ;;  %v1879_v53 = vadd.f32 %v1501_v49, %v1865_v42 }
  0xed   :  { %v1876_v52 = vadd.f32 %v1865_v42, %v406_v51 }
  0xee   :  { %v510_v61 = vsel %vm500_vm5, %v1879_v53, 0.0 }
  0xef   :  { %v1504_v54 = vpop.f32.mrb[4].mxu0  ;;  %v507_v56 = vsel %vm500_vm5, %v1876_v52, 0.0 }
  0xf0   :  { %505 = vadd.xlane.f32.xlu0 %v504_v55  ;;  %508 = vadd.xlane.f32.xlu1 %v507_v56  ;;  %v416_v57 = vpop.f32.mrb[5].mxu0  ;;  %v1889_v59 = vadd.f32 %v1504_v54, %v1865_v42 }
  0xf1   :  { %v1886_v58 = vadd.f32 %v1865_v42, %v416_v57 }
  0xf2   :  { %v516_v3 = vsel %vm500_vm5, %v1889_v59, 0.0 }
  0xf3   :  { %v1507_v60 = vpop.f32.mrb[6].mxu0  ;;  %v513_v62 = vsel %vm500_vm5, %v1886_v58, 0.0 }
  0xf4   :  { %511 = vadd.xlane.f32.xlu1 %v510_v61  ;;  %514 = vadd.xlane.f32.xlu0 %v513_v62  ;;  %v426_v63 = vpop.f32.mrb[7].mxu0  ;;  %v1899_v1 = vadd.f32 %v1507_v60, %v1865_v42 }
  0xf5   :  { %v1896_v0 = vadd.f32 %v1865_v42, %v426_v63 }
  0xf6   :  { %v522_v9 = vsel %vm500_vm5, %v1899_v1, 0.0 }
  0xf7   :  { %v1510_v2 = vpop.f32.mrb[8].mxu0  ;;  %v519_v4 = vsel %vm500_vm5, %v1896_v0, 0.0 }
  0xf8   :  { %v442_v5 = vadd.f32 %v1510_v2, %v1482_v36  ;;  %517 = vadd.xlane.f32.xlu1 %v516_v3  ;;  %520 = vadd.xlane.f32.xlu0 %v519_v4  ;;  %v436_v6 = vpop.f32.mrb[9].mxu0 }
  0xf9   :  { %v437_v7 = vadd.f32 %v436_v6, %v239_v37 }
  0xfa   :  { %v1911_v11 = vadd.f32 %v1865_v42, %v442_v5 }
  0xfb   :  { %v1513_v8 = vpop.f32.mrb[10].mxu0  ;;  %v1908_v10 = vadd.f32 %v1865_v42, %v437_v7 }
  0xfc   :  { %v452_v12 = vadd.f32 %v1513_v8, %v1485_v38  ;;  %523 = vadd.xlane.f32.xlu1 %v522_v9  ;;  %v446_v13 = vpop.f32.mrb[11].mxu0  ;;  %v528_v17 = vsel %vm500_vm5, %v1911_v11, 0.0 }
  0xfd   :  { %v447_v14 = vadd.f32 %v446_v13, %v249_v39  ;;  %v525_v15 = vsel %vm500_vm5, %v1908_v10, 0.0 }
  0xfe   :  { %526 = vadd.xlane.f32.xlu0 %v525_v15  ;;  %v1921_v19 = vadd.f32 %v1865_v42, %v452_v12 }
  0xff   :  { %v1516_v16 = vpop.f32.mrb[12].mxu0  ;;  %v1918_v18 = vadd.f32 %v1865_v42, %v447_v14 }
 0x100   :  { %v462_v20 = vadd.f32 %v1516_v16, %v1488_v40  ;;  %529 = vadd.xlane.f32.xlu1 %v528_v17  ;;  %v456_v21 = vpop.f32.mrb[13].mxu0  ;;  %v534_v25 = vsel %vm500_vm5, %v1921_v19, 0.0 }
 0x101   :  { %v457_v22 = vadd.f32 %v456_v21, %v259_v41  ;;  %v531_v23 = vsel %vm500_vm5, %v1918_v18, 0.0 }
 0x102   :  { %532 = vadd.xlane.f32.xlu0 %v531_v23  ;;  %v1931_v27 = vadd.f32 %v1865_v42, %v462_v20 }
 0x103   :  { %v1519_v24 = vpop.f32.mrb[14].mxu0  ;;  %v1928_v26 = vadd.f32 %v1865_v42, %v457_v22 }
 0x104   :  { %v472_v28 = vadd.f32 %v1519_v24, %v1491_v45  ;;  %535 = vadd.xlane.f32.xlu1 %v534_v25  ;;  %v466_v29 = vpop.f32.mrb[15].mxu0  ;;  %v540_v32 = vsel %vm500_vm5, %v1931_v27, 0.0 }
 0x105   :  { %v467_v30 = vadd.f32 %v466_v29, %v269_v47  ;;  %v537_v31 = vsel %vm500_vm5, %v1928_v26, 0.0 }
 0x106   :  { %538 = vadd.xlane.f32.xlu0 %v537_v31  ;;  %v1941_v34 = vadd.f32 %v1865_v42, %v472_v28 }
 0x107   :  { %v1938_v33 = vadd.f32 %v1865_v42, %v467_v30 }
 0x108   :  { %541 = vadd.xlane.f32.xlu1 %v540_v32  ;;  %v546_v36 = vsel %vm500_vm5, %v1941_v34, 0.0 }
 0x109   :  { %v543_v35 = vsel %vm500_vm5, %v1938_v33, 0.0 }
 0x10a   :  { %544 = vadd.xlane.f32.xlu0 %v543_v35 }
 0x10c   :  { %547 = vadd.xlane.f32.xlu1 %v546_v36 }
 0x179   :  { %v503_v37 = vpop.xlane.xlu0 %502 }
 0x17a   :  { %v550_v38 = vmul.f32 0.03125, %v503_v37 }
 0x17c   :  { %v1948_v39 = vsub.f32 %v1868_v46, %v550_v38 }
 0x17d   :  { %v506_v40 = vpop.xlane.xlu0 %505  ;;  %v509_v41 = vpop.xlane.xlu1 %508 }
 0x17e   :  { %v551_v43 = vmul.f32 0.03125, %v506_v40  ;;  %v552_v44 = vmul.f32 0.03125, %v509_v41  ;;  %v582_v42 = vmul.f32 %v1948_v39, %v1948_v39 }
 0x180   :  { %v1953_v45 = vsub.f32 %v1871_v48, %v551_v43  ;;  %v1956_v47 = vsub.f32 %v1876_v52, %v552_v44  ;;  %v598_v49 = vsel %vm500_vm5, %v582_v42, 0.0 }
 0x181   :  { %v512_v50 = vpop.xlane.xlu1 %511  ;;  %v515_v51 = vpop.xlane.xlu0 %514  ;;  %599 = vadd.xlane.f32.xlu0 %v598_v49 }
 0x182   :  { %v553_v46 = vmul.f32 0.03125, %v512_v50  ;;  %v554_v54 = vmul.f32 0.03125, %v515_v51  ;;  %v583_v55 = vmul.f32 %v1953_v45, %v1953_v45  ;;  %v584_v56 = vmul.f32 %v1956_v47, %v1956_v47 }
 0x184   :  { %v1964_v57 = vsub.f32 %v1879_v53, %v553_v46  ;;  %v1967_v48 = vsub.f32 %v1886_v58, %v554_v54  ;;  %v601_v52 = vsel %vm500_vm5, %v583_v55, 0.0  ;;  %v604_v60 = vsel %vm500_vm5, %v584_v56, 0.0 }
 0x185   :  { %v518_v61 = vpop.xlane.xlu1 %517  ;;  %v521_v62 = vpop.xlane.xlu0 %520  ;;  %602 = vadd.xlane.f32.xlu1 %v601_v52  ;;  %605 = vadd.xlane.f32.xlu0 %v604_v60 }
 0x186   :  { %v555_v63 = vmul.f32 0.03125, %v518_v61  ;;  %v556_v2 = vmul.f32 0.03125, %v521_v62  ;;  %v585_v3 = vmul.f32 %v1964_v57, %v1964_v57  ;;  %v586_v53 = vmul.f32 %v1967_v48, %v1967_v48  ;;  %v770_v62 = vld [vmem:[%s2459_s7] sm:$0xff] }
 0x188   :  { %v1976_v4 = vsub.f32 %v1889_v59, %v555_v63  ;;  %v1979_v58 = vsub.f32 %v1896_v0, %v556_v2  ;;  %v607_v5 = vsel %vm500_vm5, %v585_v3, 0.0  ;;  %v610_v6 = vsel %vm500_vm5, %v586_v53, 0.0  ;;  %v772_v2 = vld [vmem:[%s2459_s7 + $0x10] sm:$0xff]  ;;  %v773_v3 = vld [vmem:[%s2459_s7 + $0x18] sm:$0xff] }
 0x189   :  { %v524_v7 = vpop.xlane.xlu1 %523  ;;  %608 = vadd.xlane.f32.xlu1 %v607_v5  ;;  %611 = vadd.xlane.f32.xlu0 %v610_v6  ;;  %v1562_v53 = vpack.c.bf16 %v773_v3, %v772_v2 }
 0x18a   :  { %v557_v8 = vmul.f32 0.03125, %v524_v7  ;;  %v587_v9 = vmul.f32 %v1976_v4, %v1976_v4  ;;  %v588_v12 = vmul.f32 %v1979_v58, %v1979_v58 }
 0x18b   :  { %v527_v13 = vpop.xlane.xlu0 %526 }
 0x18c   :  { %v1988_v59 = vsub.f32 %v1899_v1, %v557_v8  ;;  %v558_v0 = vmul.f32 0.03125, %v527_v13  ;;  %v613_v14 = vsel %vm500_vm5, %v587_v9, 0.0  ;;  %v616_v15 = vsel %vm500_vm5, %v588_v12, 0.0 }
 0x18d   :  { %v530_v16 = vpop.xlane.xlu1 %529  ;;  %614 = vadd.xlane.f32.xlu1 %v613_v14  ;;  %617 = vadd.xlane.f32.xlu0 %v616_v15 }
 0x18e   :  { %v1993_v17 = vsub.f32 %v1908_v10, %v558_v0  ;;  %v559_v20 = vmul.f32 0.03125, %v530_v16  ;;  %v589_v21 = vmul.f32 %v1988_v59, %v1988_v59 }
 0x18f   :  { %v533_v22 = vpop.xlane.xlu0 %532 }
 0x190   :  { %v1998_v23 = vsub.f32 %v1911_v11, %v559_v20  ;;  %v560_v1 = vmul.f32 0.03125, %v533_v22  ;;  %v619_v24 = vsel %vm500_vm5, %v589_v21, 0.0  ;;  %v590_v25 = vmul.f32 %v1993_v17, %v1993_v17 }
 0x191   :  { %v536_v28 = vpop.xlane.xlu1 %535  ;;  %620 = vadd.xlane.f32.xlu1 %v619_v24 }
 0x192   :  { %v2004_v29 = vsub.f32 %v1918_v18, %v560_v1  ;;  %v561_v10 = vmul.f32 0.03125, %v536_v28  ;;  %v622_v30 = vsel %vm500_vm5, %v590_v25, 0.0  ;;  %v591_v31 = vmul.f32 %v1998_v23, %v1998_v23 }
 0x193   :  { %623 = vadd.xlane.f32.xlu0 %v622_v30  ;;  %v539_v11 = vpop.xlane.xlu0 %538 }
 0x194   :  { %v2010_v32 = vsub.f32 %v1921_v19, %v561_v10  ;;  %v562_v35 = vmul.f32 0.03125, %v539_v11  ;;  %v625_v36 = vsel %vm500_vm5, %v591_v31, 0.0  ;;  %v592_v37 = vmul.f32 %v2004_v29, %v2004_v29  ;;  %v2058_v31 = vld [vmem:[%s2460_s5] ss:$0 sm:$0xff] }
 0x195   :  { %v542_v38 = vpop.xlane.xlu1 %541  ;;  %626 = vadd.xlane.f32.xlu1 %v625_v36 }
 0x196   :  { %v2016_v18 = vsub.f32 %v1928_v26, %v562_v35  ;;  %v563_v40 = vmul.f32 0.03125, %v542_v38  ;;  %v628_v41 = vsel %vm500_vm5, %v592_v37, 0.0  ;;  %v593_v43 = vmul.f32 %v2010_v32, %v2010_v32  ;;  %v2064_v38 = vld [vmem:[%s2461_s6] ss:$0 sm:$0xff] }
 0x197   :  { %629 = vadd.xlane.f32.xlu0 %v628_v41  ;;  %v545_v19 = vpop.xlane.xlu0 %544 }
 0x198   :  { %v2022_v44 = vsub.f32 %v1931_v27, %v563_v40  ;;  %v564_v42 = vmul.f32 0.03125, %v545_v19  ;;  %v631_v49 = vsel %vm500_vm5, %v593_v43, 0.0  ;;  %v594_v50 = vmul.f32 %v2016_v18, %v2016_v18 }
 0x199   :  { %632 = vadd.xlane.f32.xlu1 %v631_v49  ;;  %v548_v26 = vpop.xlane.xlu1 %547 }
 0x19a   :  { %v2028_v51 = vsub.f32 %v1938_v33, %v564_v42  ;;  %v565_v46 = vmul.f32 0.03125, %v548_v26  ;;  %v634_v54 = vsel %vm500_vm5, %v594_v50, 0.0  ;;  %v595_v55 = vmul.f32 %v2022_v44, %v2022_v44 }
 0x19b   :  { %635 = vadd.xlane.f32.xlu0 %v634_v54 }
 0x19c   :  { %v2034_v27 = vsub.f32 %v1941_v34, %v565_v46  ;;  %v637_v56 = vsel %vm500_vm5, %v595_v55, 0.0  ;;  %v596_v52 = vmul.f32 %v2028_v51, %v2028_v51  ;;  %v771_v34 = vld [vmem:[%s2459_s7 + $0x8] sm:$0xff] }
 0x19d   :  { %638 = vadd.xlane.f32.xlu1 %v637_v56  ;;  %v1558_v63 = vpack.c.bf16 %v771_v34, %v770_v62 }
 0x19e   :  { %v640_v60 = vsel %vm500_vm5, %v596_v52, 0.0  ;;  %v597_v33 = vmul.f32 %v2034_v27, %v2034_v27 }
 0x19f   :  { %641 = vadd.xlane.f32.xlu0 %v640_v60  ;;  %1559 = vmatprep.subr.bf16.mxu1 %v1558_v63 }
 0x1a0   :  { %v643_v61 = vsel %vm500_vm5, %v597_v33, 0.0  ;;  %1561 = vmatpush3.bf16.msra.mxu1 %v1558_v63 }
 0x1a1   :  { %644 = vadd.xlane.f32.xlu1 %v643_v61  ;;  %1563 = vmatprep.subr.bf16.mxu1 %v1562_v53 }
 0x1a4   :  { %1565 = vmatpush3.bf16.msra.mxu1 %v1562_v53 }
 0x20e   :  { %v600_v5 = vpop.xlane.xlu0 %599 }
 0x20f   :  { %v646_v6 = vmul.f32 0.03125, %v600_v5 }
 0x211   :  { %v662_v7 = vadd.f32 1e-05, %v646_v6 }
 0x212   :  { %v603_v8 = vpop.xlane.xlu1 %602  ;;  %v606_v9 = vpop.xlane.xlu0 %605 }
 0x213   :  { %1585 = vrsqrt.f32 %v662_v7  ;;  %v647_v12 = vmul.f32 0.03125, %v603_v8  ;;  %v648_v13 = vmul.f32 0.03125, %v606_v9 }
 0x215   :  { %v663_v0 = vadd.f32 1e-05, %v647_v12  ;;  %v664_v14 = vadd.f32 1e-05, %v648_v13 }
 0x216   :  { %v609_v15 = vpop.xlane.xlu1 %608  ;;  %v612_v16 = vpop.xlane.xlu0 %611 }
 0x217   :  { %1587 = vrsqrt.f32 %v663_v0  ;;  %v649_v20 = vmul.f32 0.03125, %v609_v15  ;;  %v650_v21 = vmul.f32 0.03125, %v612_v16 }
 0x218   :  { %1589 = vrsqrt.f32 %v664_v14 }
 0x219   :  { %v665_v22 = vadd.f32 1e-05, %v649_v20  ;;  %v666_v1 = vadd.f32 1e-05, %v650_v21 }
 0x21a   :  { %v615_v24 = vpop.xlane.xlu1 %614  ;;  %v618_v25 = vpop.xlane.xlu0 %617 }
 0x21b   :  { %1591 = vrsqrt.f32 %v665_v22  ;;  %v651_v28 = vmul.f32 0.03125, %v615_v24  ;;  %v652_v10 = vmul.f32 0.03125, %v618_v25 }
 0x21c   :  { %1593 = vrsqrt.f32 %v666_v1 }
 0x21d   :  { %v1586_v30 = vpop.eup %1585  ;;  %v667_v11 = vadd.f32 1e-05, %v651_v28  ;;  %v668_v35 = vadd.f32 1e-05, %v652_v10 }
 0x21e   :  { %v621_v36 = vpop.xlane.xlu1 %620  ;;  %v694_v37 = vmul.f32 %v1586_v30, %v1948_v39 }
 0x21f   :  { %1595 = vrsqrt.f32 %v667_v11  ;;  %v653_v40 = vmul.f32 0.03125, %v621_v36 }
 0x220   :  { %1597 = vrsqrt.f32 %v668_v35  ;;  %v624_v41 = vpop.xlane.xlu0 %623  ;;  %v716_v43 = vmul.f32 %v2058_v31, %v694_v37 }
 0x221   :  { %v1588_v19 = vpop.eup %1587  ;;  %v669_v42 = vadd.f32 1e-05, %v653_v40  ;;  %v654_v49 = vmul.f32 0.03125, %v624_v41 }
 0x222   :  { %v1590_v50 = vpop.eup %1589  ;;  %v695_v26 = vmul.f32 %v1588_v19, %v1953_v45  ;;  %v627_v46 = vpop.xlane.xlu1 %626  ;;  %v738_v39 = vadd.f32 %v2064_v38, %v716_v43 }
 0x223   :  { %1599 = vrsqrt.f32 %v669_v42  ;;  %v670_v54 = vadd.f32 1e-05, %v654_v49  ;;  %v655_v55 = vmul.f32 0.03125, %v627_v46  ;;  %v696_v56 = vmul.f32 %v1590_v50, %v1956_v47 }
 0x224   :  { %v717_v52 = vmul.f32 %v2058_v31, %v695_v26  ;;  %v630_v60 = vpop.xlane.xlu0 %629  ;;  %v754_v33 = vmax.f32 %v738_v39, 0.0 }
 0x225   :  { %v1592_v61 = vpop.eup %1591  ;;  %1601 = vrsqrt.f32 %v670_v54  ;;  %v671_v62 = vadd.f32 1e-05, %v655_v55  ;;  %v656_v34 = vmul.f32 0.03125, %v630_v60  ;;  %v718_v63 = vmul.f32 %v2058_v31, %v696_v56 }
 0x226   :  { %v1594_v2 = vpop.eup %1593  ;;  %v739_v45 = vadd.f32 %v2064_v38, %v717_v52  ;;  %v633_v3 = vpop.xlane.xlu1 %632  ;;  %1528 = vmatprep.mubr.msk.f32.mxu1 %vm500_vm5, %v754_v33  ;;  %v697_v53 = vmul.f32 %v1592_v61, %v1964_v57 }
 0x227   :  { %1603 = vrsqrt.f32 %v671_v62  ;;  %v672_v47 = vadd.f32 1e-05, %v656_v34  ;;  %v657_v5 = vmul.f32 0.03125, %v633_v3  ;;  %v740_v6 = vadd.f32 %v2064_v38, %v718_v63 }
 0x228   :  { %v755_v7 = vmax.f32 %v739_v45, 0.0  ;;  %v636_v8 = vpop.xlane.xlu0 %635  ;;  %v719_v9 = vmul.f32 %v2058_v31, %v697_v53  ;;  %v698_v12 = vmul.f32 %v1594_v2, %v1967_v48 }
 0x229   :  { %v1596_v13 = vpop.eup %1595  ;;  %1605 = vrsqrt.f32 %v672_v47  ;;  %v673_v0 = vadd.f32 1e-05, %v657_v5  ;;  %v658_v14 = vmul.f32 0.03125, %v636_v8  ;;  %v756_v15 = vmax.f32 %v740_v6, 0.0 }
 0x22a   :  { %v1598_v16 = vpop.eup %1597  ;;  %v639_v20 = vpop.xlane.xlu1 %638  ;;  %1529 = vmatmul.mubr.msk.f32.vlgmr.msra.gmra.mrb[8].mxu1 %vm500_vm5, %v755_v7  ;;  %v741_v57 = vadd.f32 %v2064_v38, %v719_v9  ;;  %v720_v21 = vmul.f32 %v2058_v31, %v698_v12  ;;  %v699_v22 = vmul.f32 %v1596_v13, %v1976_v4 }
 0x22b   :  { %1607 = vrsqrt.f32 %v673_v0  ;;  %v674_v1 = vadd.f32 1e-05, %v658_v14  ;;  %v659_v24 = vmul.f32 0.03125, %v639_v20  ;;  %1531 = vmatprep.mubr.msk.f32.mxu1 %vm500_vm5, %v756_v15  ;;  %v700_v48 = vmul.f32 %v1598_v16, %v1979_v58 }
 0x22c   :  { %v642_v25 = vpop.xlane.xlu0 %641  ;;  %v757_v28 = vmax.f32 %v741_v57, 0.0  ;;  %v742_v10 = vadd.f32 %v2064_v38, %v720_v21  ;;  %v721_v30 = vmul.f32 %v2058_v31, %v699_v22 }
 0x22d   :  { %v1600_v11 = vpop.eup %1599  ;;  %1609 = vrsqrt.f32 %v674_v1  ;;  %v675_v35 = vadd.f32 1e-05, %v659_v24  ;;  %v660_v36 = vmul.f32 0.03125, %v642_v25  ;;  %v722_v37 = vmul.f32 %v2058_v31, %v700_v48 }
 0x22e   :  { %v645_v4 = vpop.xlane.xlu1 %644  ;;  %1532 = vmatmul.mubr.msk.f32.gmra.mrb[10].mxu1 %vm500_vm5, %v757_v28  ;;  %v758_v40 = vmax.f32 %v742_v10, 0.0  ;;  %v743_v41 = vadd.f32 %v2064_v38, %v721_v30  ;;  %v701_v58 = vmul.f32 %v1600_v11, %v1988_v59 }
 0x22f   :  { %v1602_v43 = vpop.eup %1601  ;;  %1611 = vrsqrt.f32 %v675_v35  ;;  %v676_v19 = vadd.f32 1e-05, %v660_v36  ;;  %v661_v42 = vmul.f32 0.03125, %v645_v4  ;;  %v744_v49 = vadd.f32 %v2064_v38, %v722_v37 }
 0x230   :  { %1534 = vmatprep.mubr.msk.f32.mxu1 %vm500_vm5, %v758_v40  ;;  %v759_v50 = vmax.f32 %v743_v41, 0.0  ;;  %v723_v26 = vmul.f32 %v2058_v31, %v701_v58  ;;  %v702_v46 = vmul.f32 %v1602_v43, %v1993_v17 }
 0x231   :  { %v1604_v39 = vpop.eup %1603  ;;  %1613 = vrsqrt.f32 %v676_v19  ;;  %v677_v54 = vadd.f32 1e-05, %v661_v42  ;;  %v760_v55 = vmax.f32 %v744_v49, 0.0 }
 0x232   :  { %1535 = vmatmul.mubr.msk.f32.gmra.mrb[12].mxu1 %vm500_vm5, %v759_v50  ;;  %v745_v59 = vadd.f32 %v2064_v38, %v723_v26  ;;  %v724_v56 = vmul.f32 %v2058_v31, %v702_v46  ;;  %v703_v52 = vmul.f32 %v1604_v39, %v1998_v23 }
 0x233   :  { %v1606_v60 = vpop.eup %1605  ;;  %1615 = vrsqrt.f32 %v677_v54  ;;  %1537 = vmatprep.mubr.msk.f32.mxu1 %vm500_vm5, %v760_v55 }
 0x234   :  { %v761_v33 = vmax.f32 %v745_v59, 0.0  ;;  %v746_v61 = vadd.f32 %v2064_v38, %v724_v56  ;;  %v725_v17 = vmul.f32 %v2058_v31, %v703_v52  ;;  %v704_v62 = vmul.f32 %v1606_v60, %v2004_v29 }
 0x235   :  { %v1608_v34 = vpop.eup %1607 }
 0x236   :  { %1538 = vmatmul.mubr.msk.f32.gmra.mrb[14].mxu1 %vm500_vm5, %v761_v33  ;;  %v762_v63 = vmax.f32 %v746_v61, 0.0  ;;  %v747_v2 = vadd.f32 %v2064_v38, %v725_v17  ;;  %v726_v45 = vmul.f32 %v2058_v31, %v704_v62  ;;  %v705_v23 = vmul.f32 %v1608_v34, %v2010_v32 }
 0x237   :  { %v1610_v3 = vpop.eup %1609 }
 0x238   :  { %1540 = vmatprep.mubr.msk.f32.mxu1 %vm500_vm5, %v762_v63  ;;  %v763_v53 = vmax.f32 %v747_v2, 0.0  ;;  %v748_v47 = vadd.f32 %v2064_v38, %v726_v45  ;;  %v727_v5 = vmul.f32 %v2058_v31, %v705_v23  ;;  %v706_v29 = vmul.f32 %v1610_v3, %v2016_v18 }
 0x239   :  { %v1612_v6 = vpop.eup %1611 }
 0x23a   :  { %1541 = vmatmul.mubr.msk.f32.gmra.mrb[16].mxu1 %vm500_vm5, %v763_v53  ;;  %v764_v7 = vmax.f32 %v748_v47, 0.0  ;;  %v749_v8 = vadd.f32 %v2064_v38, %v727_v5  ;;  %v728_v9 = vmul.f32 %v2058_v31, %v706_v29  ;;  %v707_v32 = vmul.f32 %v1612_v6, %v2022_v44 }
 0x23b   :  { %v1614_v12 = vpop.eup %1613 }
 0x23c   :  { %1543 = vmatprep.mubr.msk.f32.mxu1 %vm500_vm5, %v764_v7  ;;  %v765_v13 = vmax.f32 %v749_v8, 0.0  ;;  %v750_v0 = vadd.f32 %v2064_v38, %v728_v9  ;;  %v729_v14 = vmul.f32 %v2058_v31, %v707_v32  ;;  %v708_v18 = vmul.f32 %v1614_v12, %v2028_v51 }
 0x23d   :  { %v1616_v15 = vpop.eup %1615 }
 0x23e   :  { %1544 = vmatmul.mubr.msk.f32.gmra.mrb[18].mxu1 %vm500_vm5, %v765_v13  ;;  %v766_v16 = vmax.f32 %v750_v0, 0.0  ;;  %v751_v20 = vadd.f32 %v2064_v38, %v729_v14  ;;  %v730_v57 = vmul.f32 %v2058_v31, %v708_v18  ;;  %v709_v44 = vmul.f32 %v1616_v15, %v2034_v27  ;;  %v1391_v27 = vld [vmem:[%s2462_s8] ss:$0 sm:$0xff] }
 0x240   :  { %1546 = vmatprep.mubr.msk.f32.mxu1 %vm500_vm5, %v766_v16  ;;  %v767_v21 = vmax.f32 %v751_v20, 0.0  ;;  %v752_v22 = vadd.f32 %v2064_v38, %v730_v57  ;;  %v731_v1 = vmul.f32 %v2058_v31, %v709_v44 }
 0x242   :  { %1547 = vmatmul.mubr.msk.f32.gmra.mrb[20].mxu1 %vm500_vm5, %v767_v21  ;;  %v768_v51 = vmax.f32 %v752_v22, 0.0  ;;  %v753_v24 = vadd.f32 %v2064_v38, %v731_v1 }
 0x244   :  { %1549 = vmatprep.mubr.msk.f32.mxu1 %vm500_vm5, %v768_v51  ;;  %v769_v48 = vmax.f32 %v753_v24, 0.0 }
 0x246   :  { %1550 = vmatmul.mubr.msk.f32.gmra.mrb[22].mxu1 %vm500_vm5, %v769_v48 }
 0x2fd   :  { %v1530_v25 = vpop.f32.mrb[8].mxu1 }
 0x2fe   :  { %v2132_v28 = vadd.f32 %v1530_v25, %v1391_v27  ;;  %v895_v10 = vpop.f32.mrb[9].mxu1 }
 0x2ff   :  { %v2134_v30 = vadd.f32 %v1391_v27, %v895_v10 }
 0x300   :  { %v979_v31 = vsel %vm500_vm5, %v2132_v28, 0.0 }
 0x301   :  { %980 = vadd.xlane.f32.xlu1 %v979_v31  ;;  %v1533_v38 = vpop.f32.mrb[10].mxu1  ;;  %v976_v11 = vsel %vm500_vm5, %v2134_v30, 0.0 }
 0x302   :  { %v2140_v35 = vadd.f32 %v1533_v38, %v1391_v27  ;;  %977 = vadd.xlane.f32.xlu0 %v976_v11  ;;  %v905_v36 = vpop.f32.mrb[11].mxu1 }
 0x303   :  { %v2142_v37 = vadd.f32 %v1391_v27, %v905_v36 }
 0x304   :  { %v985_v4 = vsel %vm500_vm5, %v2140_v35, 0.0 }
 0x305   :  { %986 = vadd.xlane.f32.xlu1 %v985_v4  ;;  %v1536_v40 = vpop.f32.mrb[12].mxu1  ;;  %v982_v41 = vsel %vm500_vm5, %v2142_v37, 0.0 }
 0x306   :  { %v2148_v58 = vadd.f32 %v1536_v40, %v1391_v27  ;;  %983 = vadd.xlane.f32.xlu0 %v982_v41  ;;  %v915_v43 = vpop.f32.mrb[13].mxu1 }
 0x307   :  { %v2150_v19 = vadd.f32 %v1391_v27, %v915_v43 }
 0x308   :  { %v991_v42 = vsel %vm500_vm5, %v2148_v58, 0.0 }
 0x309   :  { %992 = vadd.xlane.f32.xlu1 %v991_v42  ;;  %v1539_v49 = vpop.f32.mrb[14].mxu1  ;;  %v988_v50 = vsel %vm500_vm5, %v2150_v19, 0.0 }
 0x30a   :  { %v2156_v26 = vadd.f32 %v1539_v49, %v1391_v27  ;;  %989 = vadd.xlane.f32.xlu0 %v988_v50  ;;  %v925_v46 = vpop.f32.mrb[15].mxu1 }
 0x30b   :  { %v2158_v39 = vadd.f32 %v1391_v27, %v925_v46 }
 0x30c   :  { %v997_v54 = vsel %vm500_vm5, %v2156_v26, 0.0 }
 0x30d   :  { %998 = vadd.xlane.f32.xlu1 %v997_v54  ;;  %v1542_v55 = vpop.f32.mrb[16].mxu1  ;;  %v994_v59 = vsel %vm500_vm5, %v2158_v39, 0.0 }
 0x30e   :  { %v2164_v56 = vadd.f32 %v1542_v55, %v1391_v27  ;;  %995 = vadd.xlane.f32.xlu0 %v994_v59  ;;  %v935_v52 = vpop.f32.mrb[17].mxu1 }
 0x30f   :  { %v2166_v60 = vadd.f32 %v1391_v27, %v935_v52 }
 0x310   :  { %v1003_v33 = vsel %vm500_vm5, %v2164_v56, 0.0 }
 0x311   :  { %1004 = vadd.xlane.f32.xlu1 %v1003_v33  ;;  %v1545_v61 = vpop.f32.mrb[18].mxu1  ;;  %v1000_v17 = vsel %vm500_vm5, %v2166_v60, 0.0 }
 0x312   :  { %v2172_v62 = vadd.f32 %v1545_v61, %v1391_v27  ;;  %1001 = vadd.xlane.f32.xlu0 %v1000_v17  ;;  %v945_v34 = vpop.f32.mrb[19].mxu1 }
 0x313   :  { %v2174_v63 = vadd.f32 %v1391_v27, %v945_v34 }
 0x314   :  { %v1009_v2 = vsel %vm500_vm5, %v2172_v62, 0.0 }
 0x315   :  { %1010 = vadd.xlane.f32.xlu1 %v1009_v2  ;;  %v1548_v45 = vpop.f32.mrb[20].mxu1  ;;  %v1006_v23 = vsel %vm500_vm5, %v2174_v63, 0.0 }
 0x316   :  { %v2180_v3 = vadd.f32 %v1548_v45, %v1391_v27  ;;  %1007 = vadd.xlane.f32.xlu0 %v1006_v23  ;;  %v955_v53 = vpop.f32.mrb[21].mxu1 }
 0x317   :  { %v2182_v47 = vadd.f32 %v1391_v27, %v955_v53 }
 0x318   :  { %v1015_v5 = vsel %vm500_vm5, %v2180_v3, 0.0 }
 0x319   :  { %1016 = vadd.xlane.f32.xlu1 %v1015_v5  ;;  %v1551_v29 = vpop.f32.mrb[22].mxu1  ;;  %v1012_v6 = vsel %vm500_vm5, %v2182_v47, 0.0 }
 0x31a   :  { %v2188_v7 = vadd.f32 %v1551_v29, %v1391_v27  ;;  %1013 = vadd.xlane.f32.xlu0 %v1012_v6  ;;  %v965_v8 = vpop.f32.mrb[23].mxu1 }
 0x31b   :  { %v2190_v9 = vadd.f32 %v1391_v27, %v965_v8 }
 0x31c   :  { %v1021_v32 = vsel %vm500_vm5, %v2188_v7, 0.0 }
 0x31d   :  { %1022 = vadd.xlane.f32.xlu1 %v1021_v32  ;;  %v1018_v12 = vsel %vm500_vm5, %v2190_v9, 0.0 }
 0x31e   :  { %1019 = vadd.xlane.f32.xlu0 %v1018_v12 }
 0x38e   :  { %v981_v13 = vpop.xlane.xlu1 %980 }
 0x38f   :  { %v1025_v0 = vmul.f32 0.03125, %v981_v13  ;;  %v978_v14 = vpop.xlane.xlu0 %977 }
 0x390   :  { %v1024_v18 = vmul.f32 0.03125, %v978_v14 }
 0x391   :  { %v2197_v15 = vsub.f32 %v2132_v28, %v1025_v0 }
 0x392   :  { %v2200_v16 = vsub.f32 %v2134_v30, %v1024_v18  ;;  %v987_v20 = vpop.xlane.xlu1 %986 }
 0x393   :  { %v1027_v57 = vmul.f32 0.03125, %v987_v20  ;;  %v984_v44 = vpop.xlane.xlu0 %983  ;;  %v1057_v21 = vmul.f32 %v2197_v15, %v2197_v15 }
 0x394   :  { %v1026_v22 = vmul.f32 0.03125, %v984_v44  ;;  %v1056_v1 = vmul.f32 %v2200_v16, %v2200_v16 }
 0x395   :  { %v2207_v51 = vsub.f32 %v2140_v35, %v1027_v57  ;;  %v1075_v24 = vsel %vm500_vm5, %v1057_v21, 0.0 }
 0x396   :  { %v2211_v48 = vsub.f32 %v2142_v37, %v1026_v22  ;;  %v993_v27 = vpop.xlane.xlu1 %992  ;;  %1076 = vadd.xlane.f32.xlu1 %v1075_v24  ;;  %v1072_v25 = vsel %vm500_vm5, %v1056_v1, 0.0 }
 0x397   :  { %v1029_v28 = vmul.f32 0.03125, %v993_v27  ;;  %1073 = vadd.xlane.f32.xlu0 %v1072_v25  ;;  %v990_v10 = vpop.xlane.xlu0 %989  ;;  %v1059_v30 = vmul.f32 %v2207_v51, %v2207_v51 }
 0x398   :  { %v1028_v31 = vmul.f32 0.03125, %v990_v10  ;;  %v1058_v38 = vmul.f32 %v2211_v48, %v2211_v48 }
 0x399   :  { %v2219_v11 = vsub.f32 %v2148_v58, %v1029_v28  ;;  %v1081_v35 = vsel %vm500_vm5, %v1059_v30, 0.0 }
 0x39a   :  { %v2223_v36 = vsub.f32 %v2150_v19, %v1028_v31  ;;  %v999_v37 = vpop.xlane.xlu1 %998  ;;  %1082 = vadd.xlane.f32.xlu1 %v1081_v35  ;;  %v1078_v4 = vsel %vm500_vm5, %v1058_v38, 0.0 }
 0x39b   :  { %v1031_v40 = vmul.f32 0.03125, %v999_v37  ;;  %1079 = vadd.xlane.f32.xlu0 %v1078_v4  ;;  %v996_v41 = vpop.xlane.xlu0 %995  ;;  %v1061_v43 = vmul.f32 %v2219_v11, %v2219_v11 }
 0x39c   :  { %v1030_v42 = vmul.f32 0.03125, %v996_v41  ;;  %v1060_v58 = vmul.f32 %v2223_v36, %v2223_v36 }
 0x39d   :  { %v2231_v49 = vsub.f32 %v2156_v26, %v1031_v40  ;;  %v1087_v19 = vsel %vm500_vm5, %v1061_v43, 0.0 }
 0x39e   :  { %v2235_v50 = vsub.f32 %v2158_v39, %v1030_v42  ;;  %v1005_v46 = vpop.xlane.xlu1 %1004  ;;  %1088 = vadd.xlane.f32.xlu1 %v1087_v19  ;;  %v1084_v54 = vsel %vm500_vm5, %v1060_v58, 0.0 }
 0x39f   :  { %v1033_v55 = vmul.f32 0.03125, %v1005_v46  ;;  %1085 = vadd.xlane.f32.xlu0 %v1084_v54  ;;  %v1002_v59 = vpop.xlane.xlu0 %1001  ;;  %v1063_v52 = vmul.f32 %v2231_v49, %v2231_v49 }
 0x3a0   :  { %v1032_v33 = vmul.f32 0.03125, %v1002_v59  ;;  %v1062_v26 = vmul.f32 %v2235_v50, %v2235_v50 }
 0x3a1   :  { %v2243_v61 = vsub.f32 %v2164_v56, %v1033_v55  ;;  %v1093_v39 = vsel %vm500_vm5, %v1063_v52, 0.0 }
 0x3a2   :  { %v2247_v17 = vsub.f32 %v2166_v60, %v1032_v33  ;;  %v1011_v34 = vpop.xlane.xlu1 %1010  ;;  %1094 = vadd.xlane.f32.xlu1 %v1093_v39  ;;  %v1090_v2 = vsel %vm500_vm5, %v1062_v26, 0.0 }
 0x3a3   :  { %v1035_v45 = vmul.f32 0.03125, %v1011_v34  ;;  %1091 = vadd.xlane.f32.xlu0 %v1090_v2  ;;  %v1008_v23 = vpop.xlane.xlu0 %1007  ;;  %v1065_v53 = vmul.f32 %v2243_v61, %v2243_v61 }
 0x3a4   :  { %v1034_v5 = vmul.f32 0.03125, %v1008_v23  ;;  %v1064_v56 = vmul.f32 %v2247_v17, %v2247_v17 }
 0x3a5   :  { %v2255_v29 = vsub.f32 %v2172_v62, %v1035_v45  ;;  %v1099_v60 = vsel %vm500_vm5, %v1065_v53, 0.0 }
 0x3a6   :  { %v2259_v6 = vsub.f32 %v2174_v63, %v1034_v5  ;;  %v1017_v8 = vpop.xlane.xlu1 %1016  ;;  %1100 = vadd.xlane.f32.xlu1 %v1099_v60  ;;  %v1096_v32 = vsel %vm500_vm5, %v1064_v56, 0.0  ;;  %v2295_v5 = vld [vmem:[%s2463_s9] ss:$0 sm:$0xff] }
 0x3a7   :  { %v1037_v12 = vmul.f32 0.03125, %v1017_v8  ;;  %1097 = vadd.xlane.f32.xlu0 %v1096_v32  ;;  %v1014_v13 = vpop.xlane.xlu0 %1013  ;;  %v1067_v0 = vmul.f32 %v2255_v29, %v2255_v29 }
 0x3a8   :  { %v1036_v14 = vmul.f32 0.03125, %v1014_v13  ;;  %v1066_v62 = vmul.f32 %v2259_v6, %v2259_v6 }
 0x3a9   :  { %v2267_v18 = vsub.f32 %v2180_v3, %v1037_v12  ;;  %v1105_v63 = vsel %vm500_vm5, %v1067_v0, 0.0  ;;  %v2301_v0 = vld [vmem:[%s2464_s10] ss:$0 sm:$0xff] }
 0x3aa   :  { %v2271_v20 = vsub.f32 %v2182_v47, %v1036_v14  ;;  %1106 = vadd.xlane.f32.xlu1 %v1105_v63  ;;  %v1023_v57 = vpop.xlane.xlu1 %1022  ;;  %v1102_v44 = vsel %vm500_vm5, %v1066_v62, 0.0 }
 0x3ab   :  { %v1039_v21 = vmul.f32 0.03125, %v1023_v57  ;;  %1103 = vadd.xlane.f32.xlu0 %v1102_v44  ;;  %v1020_v22 = vpop.xlane.xlu0 %1019  ;;  %v1069_v1 = vmul.f32 %v2267_v18, %v2267_v18 }
 0x3ac   :  { %v1038_v24 = vmul.f32 0.03125, %v1020_v22  ;;  %v1068_v3 = vmul.f32 %v2271_v20, %v2271_v20 }
 0x3ad   :  { %v2279_v27 = vsub.f32 %v2188_v7, %v1039_v21  ;;  %v1111_v47 = vsel %vm500_vm5, %v1069_v1, 0.0 }
 0x3ae   :  { %v2283_v25 = vsub.f32 %v2190_v9, %v1038_v24  ;;  %1112 = vadd.xlane.f32.xlu1 %v1111_v47  ;;  %v1108_v28 = vsel %vm500_vm5, %v1068_v3, 0.0 }
 0x3af   :  { %1109 = vadd.xlane.f32.xlu0 %v1108_v28  ;;  %v1071_v10 = vmul.f32 %v2279_v27, %v2279_v27 }
 0x3b0   :  { %v1070_v30 = vmul.f32 %v2283_v25, %v2283_v25 }
 0x3b1   :  { %v1117_v31 = vsel %vm500_vm5, %v1071_v10, 0.0 }
 0x3b2   :  { %1118 = vadd.xlane.f32.xlu1 %v1117_v31  ;;  %v1114_v7 = vsel %vm500_vm5, %v1070_v30, 0.0 }
 0x3b3   :  { %1115 = vadd.xlane.f32.xlu0 %v1114_v7 }
 0x423   :  { %v1077_v38 = vpop.xlane.xlu1 %1076 }
 0x424   :  { %v1121_v35 = vmul.f32 0.03125, %v1077_v38  ;;  %v1074_v9 = vpop.xlane.xlu0 %1073 }
 0x425   :  { %v1120_v37 = vmul.f32 0.03125, %v1074_v9 }
 0x426   :  { %v1137_v4 = vadd.f32 1e-05, %v1121_v35 }
 0x427   :  { %v1136_v40 = vadd.f32 1e-05, %v1120_v37  ;;  %v1083_v41 = vpop.xlane.xlu1 %1082 }
 0x428   :  { %1617 = vrsqrt.f32 %v1137_v4  ;;  %v1123_v43 = vmul.f32 0.03125, %v1083_v41  ;;  %v1080_v42 = vpop.xlane.xlu0 %1079 }
 0x429   :  { %1619 = vrsqrt.f32 %v1136_v40  ;;  %v1122_v58 = vmul.f32 0.03125, %v1080_v42 }
 0x42a   :  { %v1139_v19 = vadd.f32 1e-05, %v1123_v43 }
 0x42b   :  { %v1138_v46 = vadd.f32 1e-05, %v1122_v58  ;;  %v1089_v54 = vpop.xlane.xlu1 %1088 }
 0x42c   :  { %1621 = vrsqrt.f32 %v1139_v19  ;;  %v1125_v55 = vmul.f32 0.03125, %v1089_v54  ;;  %v1086_v59 = vpop.xlane.xlu0 %1085 }
 0x42d   :  { %1623 = vrsqrt.f32 %v1138_v46  ;;  %v1124_v52 = vmul.f32 0.03125, %v1086_v59 }
 0x42e   :  { %v1141_v33 = vadd.f32 1e-05, %v1125_v55 }
 0x42f   :  { %v1140_v26 = vadd.f32 1e-05, %v1124_v52  ;;  %v1095_v39 = vpop.xlane.xlu1 %1094 }
 0x430   :  { %1625 = vrsqrt.f32 %v1141_v33  ;;  %v1127_v34 = vmul.f32 0.03125, %v1095_v39  ;;  %v1092_v2 = vpop.xlane.xlu0 %1091 }
 0x431   :  { %v1126_v45 = vmul.f32 0.03125, %v1092_v2  ;;  %1627 = vrsqrt.f32 %v1140_v26 }
 0x432   :  { %v1618_v23 = vpop.eup %1617  ;;  %v1143_v53 = vadd.f32 1e-05, %v1127_v34 }
 0x433   :  { %v1620_v56 = vpop.eup %1619  ;;  %v1142_v60 = vadd.f32 1e-05, %v1126_v45  ;;  %v1101_v8 = vpop.xlane.xlu1 %1100  ;;  %v1169_v32 = vmul.f32 %v1618_v23, %v2197_v15 }
 0x434   :  { %1629 = vrsqrt.f32 %v1143_v53  ;;  %v1129_v12 = vmul.f32 0.03125, %v1101_v8  ;;  %v1098_v13 = vpop.xlane.xlu0 %1097  ;;  %v1168_v14 = vmul.f32 %v1620_v56, %v2200_v16  ;;  %v2311_v16 = vld [vmem:[%s2465_s11] ss:$0 sm:$0xff] }
 0x435   :  { %v1128_v62 = vmul.f32 0.03125, %v1098_v13  ;;  %v1191_v63 = vmul.f32 %v2295_v5, %v1169_v32  ;;  %1631 = vrsqrt.f32 %v1142_v60 }
 0x436   :  { %v1622_v57 = vpop.eup %1621  ;;  %v1145_v44 = vadd.f32 1e-05, %v1129_v12  ;;  %v1190_v21 = vmul.f32 %v2295_v5, %v1168_v14 }
 0x437   :  { %v1624_v22 = vpop.eup %1623  ;;  %v1144_v15 = vadd.f32 1e-05, %v1128_v62  ;;  %v1107_v1 = vpop.xlane.xlu1 %1106  ;;  %v1213_v24 = vadd.f32 %v2301_v0, %v1191_v63  ;;  %v1171_v3 = vmul.f32 %v1622_v57, %v2207_v51 }
 0x438   :  { %1633 = vrsqrt.f32 %v1145_v44  ;;  %v1131_v47 = vmul.f32 0.03125, %v1107_v1  ;;  %v1104_v28 = vpop.xlane.xlu0 %1103  ;;  %v1212_v10 = vadd.f32 %v2301_v0, %v1190_v21  ;;  %v1170_v30 = vmul.f32 %v1624_v22, %v2211_v48 }
 0x439   :  { %1635 = vrsqrt.f32 %v1144_v15  ;;  %v1130_v31 = vmul.f32 0.03125, %v1104_v28  ;;  %v1229_v7 = vmax.f32 %v1213_v24, 0.0  ;;  %v1193_v38 = vmul.f32 %v2295_v5, %v1171_v3 }
 0x43a   :  { %v1626_v35 = vpop.eup %1625  ;;  %v1147_v9 = vadd.f32 1e-05, %v1131_v47  ;;  %v1228_v51 = vmax.f32 %v1212_v10, 0.0  ;;  %v1192_v37 = vmul.f32 %v2295_v5, %v1170_v30 }
 0x43b   :  { %v1146_v4 = vadd.f32 1e-05, %v1130_v31  ;;  %v1113_v40 = vpop.xlane.xlu1 %1112  ;;  %v1252_v41 = vmul.f32 %v2311_v16, %v1229_v7  ;;  %v1215_v43 = vadd.f32 %v2301_v0, %v1193_v38  ;;  %v1173_v42 = vmul.f32 %v1626_v35, %v2219_v11  ;;  %v1628_v58 = vpop.eup %1627 }
 0x43c   :  { %1637 = vrsqrt.f32 %v1147_v9  ;;  %v1133_v48 = vmul.f32 0.03125, %v1113_v40  ;;  %v1110_v19 = vpop.xlane.xlu0 %1109  ;;  %v1251_v46 = vmul.f32 %v2311_v16, %v1228_v51  ;;  %v1214_v54 = vadd.f32 %v2301_v0, %v1192_v37 }
 0x43d   :  { %1639 = vrsqrt.f32 %v1146_v4  ;;  %v1132_v55 = vmul.f32 0.03125, %v1110_v19  ;;  %v1270_v59 = vsel %vm500_vm5, %v1252_v41, 0.0  ;;  %v1231_v52 = vmax.f32 %v1215_v43, 0.0 }
 0x43e   :  { %v1630_v33 = vpop.eup %1629  ;;  %v1149_v26 = vadd.f32 1e-05, %v1133_v48  ;;  %1271 = vadd.xlane.f32.xlu1 %v1270_v59  ;;  %v1267_v39 = vsel %vm500_vm5, %v1251_v46, 0.0  ;;  %v1230_v34 = vmax.f32 %v1214_v54, 0.0  ;;  %v1195_v11 = vmul.f32 %v2295_v5, %v1173_v42 }
 0x43f   :  { %v1148_v2 = vadd.f32 1e-05, %v1132_v55  ;;  %v1119_v45 = vpop.xlane.xlu1 %1118  ;;  %1268 = vadd.xlane.f32.xlu0 %v1267_v39  ;;  %v1254_v23 = vmul.f32 %v2311_v16, %v1231_v52  ;;  %v1172_v53 = vmul.f32 %v1628_v58, %v2223_v36  ;;  %v1175_v56 = vmul.f32 %v1630_v33, %v2231_v49  ;;  %v1632_v60 = vpop.eup %1631 }
 0x440   :  { %1641 = vrsqrt.f32 %v1149_v26  ;;  %v1135_v8 = vmul.f32 0.03125, %v1119_v45  ;;  %v1116_v32 = vpop.xlane.xlu0 %1115  ;;  %v1253_v12 = vmul.f32 %v2311_v16, %v1230_v34  ;;  %v1217_v13 = vadd.f32 %v2301_v0, %v1195_v11 }
 0x441   :  { %1643 = vrsqrt.f32 %v1148_v2  ;;  %v1134_v14 = vmul.f32 0.03125, %v1116_v32  ;;  %v1276_v62 = vsel %vm500_vm5, %v1254_v23, 0.0  ;;  %v1194_v63 = vmul.f32 %v2295_v5, %v1172_v53 }
 0x442   :  { %v1634_v57 = vpop.eup %1633  ;;  %v1151_v44 = vadd.f32 1e-05, %v1135_v8  ;;  %1277 = vadd.xlane.f32.xlu1 %v1276_v62  ;;  %v1273_v36 = vsel %vm500_vm5, %v1253_v12, 0.0  ;;  %v1233_v49 = vmax.f32 %v1217_v13, 0.0  ;;  %v1197_v21 = vmul.f32 %v2295_v5, %v1175_v56 }
 0x443   :  { %v1636_v22 = vpop.eup %1635  ;;  %v1150_v15 = vadd.f32 1e-05, %v1134_v14  ;;  %1274 = vadd.xlane.f32.xlu0 %v1273_v36  ;;  %v1216_v1 = vadd.f32 %v2301_v0, %v1194_v63  ;;  %v1174_v24 = vmul.f32 %v1632_v60, %v2235_v50  ;;  %v1177_v3 = vmul.f32 %v1634_v57, %v2243_v61 }
 0x444   :  { %1645 = vrsqrt.f32 %v1151_v44  ;;  %v1256_v47 = vmul.f32 %v2311_v16, %v1233_v49  ;;  %v1219_v28 = vadd.f32 %v2301_v0, %v1197_v21  ;;  %v1176_v10 = vmul.f32 %v1636_v22, %v2247_v17 }
 0x445   :  { %1647 = vrsqrt.f32 %v1150_v15  ;;  %v1232_v30 = vmax.f32 %v1216_v1, 0.0  ;;  %v1196_v31 = vmul.f32 %v2295_v5, %v1174_v24  ;;  %v1199_v7 = vmul.f32 %v2295_v5, %v1177_v3 }
 0x446   :  { %v1638_v38 = vpop.eup %1637  ;;  %v1282_v35 = vsel %vm500_vm5, %v1256_v47, 0.0  ;;  %v1235_v9 = vmax.f32 %v1219_v28, 0.0  ;;  %v1198_v50 = vmul.f32 %v2295_v5, %v1176_v10 }
 0x447   :  { %v1640_v61 = vpop.eup %1639  ;;  %1283 = vadd.xlane.f32.xlu1 %v1282_v35  ;;  %v1255_v51 = vmul.f32 %v2311_v16, %v1232_v30  ;;  %v1218_v37 = vadd.f32 %v2301_v0, %v1196_v31  ;;  %v1221_v17 = vadd.f32 %v2301_v0, %v1199_v7  ;;  %v1179_v4 = vmul.f32 %v1638_v38, %v2255_v29 }
 0x448   :  { %v1258_v40 = vmul.f32 %v2311_v16, %v1235_v9  ;;  %v1220_v41 = vadd.f32 %v2301_v0, %v1198_v50  ;;  %v1178_v43 = vmul.f32 %v1640_v61, %v2259_v6 }
 0x449   :  { %v1279_v42 = vsel %vm500_vm5, %v1255_v51, 0.0  ;;  %v1234_v58 = vmax.f32 %v1218_v37, 0.0  ;;  %v1237_v48 = vmax.f32 %v1221_v17, 0.0  ;;  %v1201_v19 = vmul.f32 %v2295_v5, %v1179_v4 }
 0x44a   :  { %v1642_v46 = vpop.eup %1641  ;;  %1280 = vadd.xlane.f32.xlu0 %v1279_v42  ;;  %v1288_v54 = vsel %vm500_vm5, %v1258_v40, 0.0  ;;  %v1236_v55 = vmax.f32 %v1220_v41, 0.0  ;;  %v1200_v59 = vmul.f32 %v2295_v5, %v1178_v43 }
 0x44b   :  { %v1644_v29 = vpop.eup %1643  ;;  %1289 = vadd.xlane.f32.xlu1 %v1288_v54  ;;  %v1257_v52 = vmul.f32 %v2311_v16, %v1234_v58  ;;  %v1260_v33 = vmul.f32 %v2311_v16, %v1237_v48  ;;  %v1223_v6 = vadd.f32 %v2301_v0, %v1201_v19  ;;  %v1181_v26 = vmul.f32 %v1642_v46, %v2267_v18 }
 0x44c   :  { %v1259_v39 = vmul.f32 %v2311_v16, %v1236_v55  ;;  %v1222_v34 = vadd.f32 %v2301_v0, %v1200_v59  ;;  %v1180_v11 = vmul.f32 %v1644_v29, %v2271_v20 }
 0x44d   :  { %v1285_v2 = vsel %vm500_vm5, %v1257_v52, 0.0  ;;  %v1294_v45 = vsel %vm500_vm5, %v1260_v33, 0.0  ;;  %v1239_v23 = vmax.f32 %v1223_v6, 0.0  ;;  %v1203_v53 = vmul.f32 %v2295_v5, %v1181_v26 }
 0x44e   :  { %v1646_v56 = vpop.eup %1645  ;;  %1286 = vadd.xlane.f32.xlu0 %v1285_v2  ;;  %v1238_v60 = vmax.f32 %v1222_v34, 0.0  ;;  %v1202_v8 = vmul.f32 %v2295_v5, %v1180_v11  ;;  %v1291_v18 = vsel %vm500_vm5, %v1259_v39, 0.0 }
 0x44f   :  { %v1648_v32 = vpop.eup %1647  ;;  %1295 = vadd.xlane.f32.xlu1 %v1294_v45  ;;  %v1262_v12 = vmul.f32 %v2311_v16, %v1239_v23  ;;  %v1225_v20 = vadd.f32 %v2301_v0, %v1203_v53  ;;  %v1183_v13 = vmul.f32 %v1646_v56, %v2279_v27 }
 0x450   :  { %v1261_v14 = vmul.f32 %v2311_v16, %v1238_v60  ;;  %v1224_v62 = vadd.f32 %v2301_v0, %v1202_v8  ;;  %v1182_v63 = vmul.f32 %v1648_v32, %v2283_v25 }
 0x451   :  { %v1300_v57 = vsel %vm500_vm5, %v1262_v12, 0.0  ;;  %v1241_v44 = vmax.f32 %v1225_v20, 0.0  ;;  %v1205_v36 = vmul.f32 %v2295_v5, %v1183_v13 }
 0x452   :  { %1292 = vadd.xlane.f32.xlu0 %v1291_v18  ;;  %v1240_v49 = vmax.f32 %v1224_v62, 0.0  ;;  %v1204_v21 = vmul.f32 %v2295_v5, %v1182_v63  ;;  %v1297_v22 = vsel %vm500_vm5, %v1261_v14, 0.0 }
 0x453   :  { %1301 = vadd.xlane.f32.xlu1 %v1300_v57  ;;  %v1264_v27 = vmul.f32 %v2311_v16, %v1241_v44  ;;  %v1227_v15 = vadd.f32 %v2301_v0, %v1205_v36 }
 0x454   :  { %v1263_v1 = vmul.f32 %v2311_v16, %v1240_v49  ;;  %v1226_v25 = vadd.f32 %v2301_v0, %v1204_v21  ;;  %v1316_v0 = vstv %s2466_s12 }
 0x455   :  { %v1306_v24 = vsel %vm500_vm5, %v1264_v27, 0.0  ;;  %v1243_v3 = vmax.f32 %v1227_v15, 0.0 }
 0x456   :  { %1298 = vadd.xlane.f32.xlu0 %v1297_v22  ;;  %v1242_v47 = vmax.f32 %v1226_v25, 0.0  ;;  %v1303_v28 = vsel %vm500_vm5, %v1263_v1, 0.0 }
 0x457   :  { %1307 = vadd.xlane.f32.xlu1 %v1306_v24  ;;  %v1266_v5 = vmul.f32 %v2311_v16, %v1243_v3 }
 0x458   :  { %v1265_v10 = vmul.f32 %v2311_v16, %v1242_v47 }
 0x459   :  { %v1312_v30 = vsel %vm500_vm5, %v1266_v5, 0.0 }
 0x45a   :  { %1304 = vadd.xlane.f32.xlu0 %v1303_v28  ;;  %v1309_v31 = vsel %vm500_vm5, %v1265_v10, 0.0 }
 0x45b   :  { %1313 = vadd.xlane.f32.xlu1 %v1312_v30 }
 0x45e   :  { %1310 = vadd.xlane.f32.xlu0 %v1309_v31 }
 0x4cb   :  { %v1272_v7 = vpop.xlane.xlu1 %1271 }
 0x4cc   :  { %v1318_v38 = vadd.f32 %v1316_v0, %v1272_v7  ;;  %v1269_v35 = vpop.xlane.xlu0 %1268 }
 0x4cd   :  { %v1317_v9 = vadd.f32 %v1316_v0, %v1269_v35 }
 0x4ce   :  { %1335 = vst.msk [vmem:[%s2467_s13 + $0x8] sm:$0xff] %vm1333_vm6, %v1318_v38 }
 0x4cf   :  { %1334 = vst.msk [vmem:[%s2467_s13] sm:$0xff] %vm1333_vm6, %v1317_v9  ;;  %v1278_v16 = vpop.xlane.xlu1 %1277 }
 0x4d0   :  { %v1320_v50 = vadd.f32 %v1316_v0, %v1278_v16  ;;  %v1275_v61 = vpop.xlane.xlu0 %1274 }
 0x4d1   :  { %v1319_v51 = vadd.f32 %v1316_v0, %v1275_v61 }
 0x4d2   :  { %1337 = vst.msk [vmem:[%s2467_s13 + $0x18] sm:$0xff] %vm1333_vm6, %v1320_v50 }
 0x4d3   :  { %1336 = vst.msk [vmem:[%s2467_s13 + $0x10] sm:$0xff] %vm1333_vm6, %v1319_v51 }
 0x4d4   :  { %v1284_v37 = vpop.xlane.xlu1 %1283 }
 0x4d5   :  { %v1322_v17 = vadd.f32 %v1316_v0, %v1284_v37 }
 0x4d7   :  { %1339 = vst.msk [vmem:[%s2467_s13 + $0x28] sm:$0xff] %vm1333_vm6, %v1322_v17  ;;  %v1281_v4 = vpop.xlane.xlu0 %1280 }
 0x4d8   :  { %v1321_v40 = vadd.f32 %v1316_v0, %v1281_v4  ;;  %v1290_v41 = vpop.xlane.xlu1 %1289 }
 0x4d9   :  { %v1324_v43 = vadd.f32 %v1316_v0, %v1290_v41 }
 0x4da   :  { %1338 = vst.msk [vmem:[%s2467_s13 + $0x20] sm:$0xff] %vm1333_vm6, %v1321_v40 }
 0x4db   :  { %1341 = vst.msk [vmem:[%s2467_s13 + $0x38] sm:$0xff] %vm1333_vm6, %v1324_v43  ;;  %v1287_v42 = vpop.xlane.xlu0 %1286 }
 0x4dc   :  { %v1323_v58 = vadd.f32 %v1316_v0, %v1287_v42  ;;  %v1296_v48 = vpop.xlane.xlu1 %1295 }
 0x4dd   :  { %v1326_v19 = vadd.f32 %v1316_v0, %v1296_v48 }
 0x4de   :  { %1340 = vst.msk [vmem:[%s2467_s13 + $0x30] sm:$0xff] %vm1333_vm6, %v1323_v58 }
 0x4df   :  { %1343 = vst.msk [vmem:[%s2467_s13 + $0x48] sm:$0xff] %vm1333_vm6, %v1326_v19  ;;  %v1293_v46 = vpop.xlane.xlu0 %1292 }
 0x4e0   :  { %v1325_v54 = vadd.f32 %v1316_v0, %v1293_v46  ;;  %v1302_v55 = vpop.xlane.xlu1 %1301 }
 0x4e1   :  { %v1328_v59 = vadd.f32 %v1316_v0, %v1302_v55 }
 0x4e2   :  { %1342 = vst.msk [vmem:[%s2467_s13 + $0x40] sm:$0xff] %vm1333_vm6, %v1325_v54 }
 0x4e3   :  { %1345 = vst.msk [vmem:[%s2467_s13 + $0x58] sm:$0xff] %vm1333_vm6, %v1328_v59  ;;  %v1299_v29 = vpop.xlane.xlu0 %1298 }
 0x4e4   :  { %v1327_v52 = vadd.f32 %v1316_v0, %v1299_v29  ;;  %v1308_v33 = vpop.xlane.xlu1 %1307 }
 0x4e5   :  { %v1330_v6 = vadd.f32 %v1316_v0, %v1308_v33 }
 0x4e6   :  { %1344 = vst.msk [vmem:[%s2467_s13 + $0x50] sm:$0xff] %vm1333_vm6, %v1327_v52 }
 0x4e7   :  { %1347 = vst.msk [vmem:[%s2467_s13 + $0x68] sm:$0xff] %vm1333_vm6, %v1330_v6  ;;  %v1305_v26 = vpop.xlane.xlu0 %1304 }
 0x4e8   :  { %v1329_v39 = vadd.f32 %v1316_v0, %v1305_v26  ;;  %v1314_v34 = vpop.xlane.xlu1 %1313 }
 0x4e9   :  { %v1332_v11 = vadd.f32 %v1316_v0, %v1314_v34 }
 0x4ea   :  { %1346 = vst.msk [vmem:[%s2467_s13 + $0x60] sm:$0xff] %vm1333_vm6, %v1329_v39 }
 0x4eb   :  { %1349 = vst.msk [vmem:[%s2467_s13 + $0x78] sm:$0xff] %vm1333_vm6, %v1332_v11  ;;  %v1311_v2 = vpop.xlane.xlu0 %1310 }
 0x4ec   :  { %v1331_v45 = vadd.f32 %v1316_v0, %v1311_v2 }
 0x4ee   :  { %1348 = vst.msk [vmem:[%s2467_s13 + $0x70] sm:$0xff] %vm1333_vm6, %v1331_v45 }

</bundles_post_ra>
